<compile_context>
chip_gen: v7x
topology: tpu7x:2x2x1
jax: 0.10.0
libtpu: 0.0.40
codegen_flags: <defaults>
</compile_context>

<pallas_src>
import jax
import jax.numpy as jnp
from jax import lax
from jax.experimental import pallas as pl
from jax.experimental.pallas import tpu as pltpu

# ---- configuration (mirrors `opt`) ----
B = 2          # batch
L = 8          # text sequence length (max)
LA = 4         # aspect sequence length (max)
E = 16         # opt.embed_dim
H = 32         # opt.hidden_dim   (E != H -> transform Linear exists)
P = 3          # opt.polarities_dim
V = 50         # vocab size

# ---- row offsets inside the single packed weight operand  w_pack : [W_ROWS, 4H] ----
RW_TEXT = 0                                   # w_ih text half   [E, 4H]
RW_ASP = E                                    # w_ih aspect half [E, 4H]
RW_HH = 2 * E                                 # w_hh             [H, 4H]
RW_B = 2 * E + H                              # lstm bias        [1, 4H]
RW_EPI = ((RW_B + 1 + 7) // 8) * 8            # folded head  w_k@w_p@w_d   [H, :H] (8-aligned)
RW_BEPI = RW_EPI + H                          # folded head bias           [1, :H]
RW_WK1 = RW_BEPI + 1                          # folded key score vec w_k@w1 [1, :H]
RW_QV = RW_WK1 + 1                            # folded query vec (+const)   [1, :E+2]
W_ROWS = RW_QV + 1


# ---------------------------------------------------------------------------
# Fused kernel:
#   x_ref   : [L, B, E]        time-major text embeddings
#   aux_ref : [B, E+2]         [ averaged aspect | x_len | 1.0 ]
#   w_ref   : [W_ROWS, 4H]     packed LSTM + folded attention/head weights
#   out_ref : [B, H]           dense head output (columns >= P are zero)
# ---------------------------------------------------------------------------
def ae_lstm_kernel(x_ref, aux_ref, w_ref, out_ref):
    f32 = jnp.float32

    # ---- packed weights (static row slices; attention rows only use lanes < H) ----
    w_text = w_ref[RW_TEXT:RW_TEXT + E, :]            # [E, 4H]
    w_asp = w_ref[RW_ASP:RW_ASP + E, :]               # [E, 4H]
    w_hh = w_ref[RW_HH:RW_HH + H, :]                  # [H, 4H]
    b_l = w_ref[RW_B:RW_B + 1, :]                     # [1, 4H]
    W_epi = w_ref[RW_EPI:RW_EPI + H, :H]              # [H, H]   (cols >= P are zero)
    b_epi = w_ref[RW_BEPI:RW_BEPI + 1, :H]            # [1, H]
    wk1 = w_ref[RW_WK1:RW_WK1 + 1, :H]                # [1, H]   folded key score vector
    qvec = w_ref[RW_QV:RW_QV + 1, :E + 2]             # [1, E+2] folded query vec (+const)

    aux = aux_ref[...]                                # [B, E+2]
    asp = aux[:, :E]                                  # [B, E]
    x_len = aux[:, E:E + 1]                           # [B, 1] float lengths

    # ---- folded query-path score:  qs = asp @ (w_t@w_q@w2) + const  (const rides on the
    #      ones-column of aux; the length column has weight 0) ----
    qs = jnp.sum(aux * qvec, axis=-1, keepdims=True)                       # [B, 1]

    # ---- hoisted LSTM input projection: one MXU matmul for all L steps + aspect row bias ----
    x_flat = x_ref[...].reshape(L * B, E)                                  # time-major rows
    asp_bias = jnp.dot(asp, w_asp, preferred_element_type=f32) + b_l       # [B, 4H]
    xw = (jnp.dot(x_flat, w_text, preferred_element_type=f32)
          ).reshape(L, B, 4 * H) + asp_bias[None]                          # [L, B, 4H]

    # ---- LSTM recurrence, fully unrolled; h/c live in vregs.  The masked hidden state and
    #      its folded MLP score are computed inline so the scheduler can overlap them with
    #      the next step's matmul. ----
    # TODO(synk): hold w_hh resident in the MXU across the 8 steps via
    #             pltpu.matmul_push_rhs / matmul_acc_lhs / matmul_pop (MRB accumulate on v7x)
    #             once that explicit-MXU path is validated; jnp.dot re-streams the RHS.
    h = jnp.zeros((B, H), f32)
    c = jnp.zeros((B, H), f32)
    hm, sc = [], []
    for t in range(L):
        gates = xw[t] + jnp.dot(h, w_hh, preferred_element_type=f32)       # [B, 4H]
        sg = jax.nn.sigmoid(gates)        # one full-vreg EUP pass (i, f, o lanes used)
        tg = jnp.tanh(gates)              # one full-vreg EUP pass (g lanes used)
        c = sg[:, H:2 * H] * c + sg[:, :H] * tg[:, 2 * H:3 * H]
        h = sg[:, 3 * H:] * jnp.tanh(c)
        keep_t = (x_len > float(t)).astype(f32)                            # [B, 1] length mask
        hm_t = h * keep_t                                                  # [B, H]
        hm.append(hm_t)
        sc.append(jnp.tanh(jnp.sum(hm_t * wk1, axis=-1, keepdims=True) + qs))  # [B, 1]

    # ---- softmax over the L positions + context, accumulated per step (no restack) ----
    m = sc[0]
    for t in range(1, L):
        m = jnp.maximum(m, sc[t])
    e0 = jnp.exp(sc[0] - m)
    denom = e0
    ctx = e0 * hm[0]
    for t in range(1, L):
        e_t = jnp.exp(sc[t] - m)
        denom = denom + e_t
        ctx = ctx + e_t * hm[t]
    ctx = ctx / denom                                                      # [B, H]

    # ---- folded head: single MXU matmul ----
    out_ref[...] = jnp.dot(ctx, W_epi, preferred_element_type=f32) + b_epi


def ae_lstm_pallas(x_tm, aux, w_pack):
    # TODO(synk): if B ever grows (>=8, ideally 128+), add a leading "parallel" batch grid axis
    #             so Mosaic can fill MXU rows and shard across v7x's two TensorCores.
    out = pl.pallas_call(
        ae_lstm_kernel,
        out_shape=jax.ShapeDtypeStruct((B, H), jnp.float32),
        grid_spec=pltpu.PrefetchScalarGridSpec(
            num_scalar_prefetch=0,
            grid=(1,),
            in_specs=[
                pl.BlockSpec((L, B, E), lambda i: (0, 0, 0)),
                pl.BlockSpec((B, E + 2), lambda i: (0, 0)),
                pl.BlockSpec((W_ROWS, 4 * H), lambda i: (0, 0)),
            ],
            out_specs=pl.BlockSpec((B, H), lambda i: (0, 0)),
        ),
        compiler_params=pltpu.CompilerParams(dimension_semantics=("arbitrary",)),
    )(x_tm, aux, w_pack)
    return out[:, :P]


# ---------------------------------------------------------------------------
# Parameter packing + algebraic folding (done once, outside the per-call path)
# ---------------------------------------------------------------------------
def pack_params(p):
    f32 = jnp.float32
    w1 = p['mlp_w'][0, :H]                           # key half of mlp score vector
    w2 = p['mlp_w'][0, H:]                           # query half

    # score-path folding
    wk1 = p['w_k'] @ w1                              # [H]
    wq_w2 = p['w_q'] @ w2                            # [H]
    q_vec = p['w_t'] @ wq_w2                         # [E]
    score_const = p['b_k'][0] @ w1 + p['b_t'][0] @ wq_w2 + p['b_q'][0] @ w2   # scalar

    # head folding (uses sum(softmax) == 1)
    wp_wd = p['w_p'] @ p['w_d']                      # [H, P]
    W_epi = p['w_k'] @ wp_wd                         # [H, P]
    b_epi = p['b_k'][0] @ wp_wd + p['b_p'][0] @ p['w_d'] + p['b_d'][0]        # [P]

    wp = jnp.zeros((W_ROWS, 4 * H), f32)
    wp = wp.at[RW_TEXT:RW_TEXT + E, :].set(p['w_ih'][:E])
    wp = wp.at[RW_ASP:RW_ASP + E, :].set(p['w_ih'][E:])
    wp = wp.at[RW_HH:RW_HH + H, :].set(p['w_hh'])
    wp = wp.at[RW_B, :].set(p['b_lstm'][0])
    wp = wp.at[RW_EPI:RW_EPI + H, :P].set(W_epi)
    wp = wp.at[RW_BEPI, :P].set(b_epi)
    wp = wp.at[RW_WK1, :H].set(wk1)
    wp = wp.at[RW_QV, :E].set(q_vec)
    wp = wp.at[RW_QV, E + 1].set(score_const)
    assert wp.shape == (W_ROWS, 4 * H)
    return dict(embedding=p['embedding'], w_pack=wp)


# ---------------------------------------------------------------------------
# Full forward (glue in JAX: embedding gathers / aspect mean; no broadcast/concat/transpose
# of the embedded floats — the text gather is done directly in time-major order)
# ---------------------------------------------------------------------------
@jax.jit
def ae_lstm_forward(text_idx, aspect_idx, pp):
    emb = pp['embedding']
    x_len = jnp.sum(text_idx != 0, axis=-1).astype(jnp.float32)            # [B]
    aspect_len = jnp.sum(aspect_idx != 0, axis=-1).astype(jnp.float32)     # [B]

    x_tm = emb[jnp.transpose(text_idx)]                                    # [L, B, E]
    aspect = jnp.sum(emb[aspect_idx], axis=1) / aspect_len[:, None]        # [B, E]

    aux = jnp.concatenate(
        [aspect, x_len[:, None], jnp.ones((B, 1), jnp.float32)], axis=-1)  # [B, E+2]

    return ae_lstm_pallas(x_tm, aux, pp['w_pack'])                         # [B, P]


# ---------------------------------------------------------------------------
# Pure-JAX reference (same math, unfused) for verification
# ---------------------------------------------------------------------------
def reference_forward(text_idx, aspect_idx, p):
    emb = p['embedding']
    x_len = jnp.sum(text_idx != 0, axis=-1)
    aspect_len = jnp.sum(aspect_idx != 0, axis=-1).astype(jnp.float32)
    x = emb[text_idx]
    aspect = jnp.sum(emb[aspect_idx], axis=1) / aspect_len[:, None]
    asp_re = jnp.broadcast_to(aspect[:, None, :], (B, L, E))
    asp_x = jnp.concatenate([x, asp_re], axis=-1)

    def step(carry, x_t):
        h, c = carry
        gates = x_t @ p['w_ih'] + h @ p['w_hh'] + p['b_lstm'][0]
        i = jax.nn.sigmoid(gates[:, :H]); f = jax.nn.sigmoid(gates[:, H:2 * H])
        g = jnp.tanh(gates[:, 2 * H:3 * H]); o = jax.nn.sigmoid(gates[:, 3 * H:])
        c = f * c + i * g
        h = o * jnp.tanh(c)
        return (h, c), h

    (_, _), hs = lax.scan(step, (jnp.zeros((B, H)), jnp.zeros((B, H))),
                          jnp.transpose(asp_x, (1, 0, 2)))
    hs = jnp.transpose(hs, (1, 0, 2))                                      # [B, L, H]
    mask = (jnp.arange(L)[None, :] < x_len[:, None]).astype(jnp.float32)
    text_memory = hs * mask[:, :, None]

    asp_squ = aspect[:, None, :]
    q_t = asp_squ @ p['w_t'] + p['b_t'][0]
    kx = text_memory @ p['w_k'] + p['b_k'][0]
    qx = q_t @ p['w_q'] + p['b_q'][0]
    w1 = p['mlp_w'][0, :H]; w2 = p['mlp_w'][0, H:]
    s = jnp.tanh(kx @ w1 + qx @ w2)                                        # [B, L]
    a = jax.nn.softmax(s, axis=-1)
    ctx = jnp.einsum('bl,blh->bh', a, kx)
    proj = ctx @ p['w_p'] + p['b_p'][0]
    return proj @ p['w_d'] + p['b_d'][0]


# ---------------------------------------------------------------------------
def init_params(key):
    ks = jax.random.split(key, 16)
    sc = 0.1
    n = lambda k, s: (jax.random.normal(k, s, dtype=jnp.float32) * sc)
    emb = n(ks[0], (V, E)).at[0].set(0.0)                # row 0 = padding
    return dict(
        embedding=emb,
        w_ih=n(ks[1], (2 * E, 4 * H)), w_hh=n(ks[2], (H, 4 * H)),
        b_lstm=n(ks[3], (1, 4 * H)),
        w_t=n(ks[4], (E, H)), b_t=n(ks[5], (1, H)),
        w_k=n(ks[6], (H, H)), b_k=n(ks[7], (1, H)),
        w_q=n(ks[8], (H, H)), b_q=n(ks[9], (1, H)),
        mlp_w=n(ks[10], (1, 2 * H)),
        w_p=n(ks[11], (H, H)), b_p=n(ks[12], (1, H)),
        w_d=n(ks[13], (H, P)), b_d=n(ks[14], (1, P)),
    )


if __name__ == "__main__":
    key = jax.random.PRNGKey(0)
    k_param, k_text, k_asp = jax.random.split(key, 3)
    params = init_params(k_param)
    packed = pack_params(params)

    # text indices: lengths [6, 8]; aspect indices: lengths [2, 3] (0 = pad)
    text_tok = jax.random.randint(k_text, (B, L), minval=1, maxval=V)
    text_lens = jnp.array([6, L])
    text_idx = jnp.where(jnp.arange(L)[None, :] < text_lens[:, None], text_tok, 0)

    asp_tok = jax.random.randint(k_asp, (B, LA), minval=1, maxval=V)
    asp_lens = jnp.array([2, 3])
    aspect_idx = jnp.where(jnp.arange(LA)[None, :] < asp_lens[:, None], asp_tok, 0)

    out = ae_lstm_forward(text_idx, aspect_idx, packed)
    out = jax.block_until_ready(out)

    ref = reference_forward(text_idx, aspect_idx, params)
    assert out.shape == (B, P)
    assert bool(jnp.allclose(out, ref, atol=2e-3, rtol=2e-3))
    print("KERNEL_OK")
</pallas_src>

<mosaic_0001>
module attributes {stable_mosaic.version = 11 : i64} {
  func.func @ae_lstm_kernel(%arg0: i32, %arg1: memref<8x2x16xf32, #tpu.memory_space<vmem>>, %arg2: memref<2x18xf32, #tpu.memory_space<vmem>>, %arg3: memref<107x128xf32, #tpu.memory_space<vmem>>, %arg4: memref<2x32xf32, #tpu.memory_space<vmem>>) attributes {dimension_semantics = [#tpu.dimension_semantics<arbitrary>], iteration_bounds = array<i64: 1>, scalar_prefetch = 0 : i64, scratch_operands = 0 : i64, tpu.core_type = #tpu.core_type<tc>, window_params = [{pipeline_mode = #tpu.pipeline_mode<synchronous>, transform_indices = @transform_0, window_bounds = array<i64: 8, 2, 16>}, {pipeline_mode = #tpu.pipeline_mode<synchronous>, transform_indices = @transform_1, window_bounds = array<i64: 2, 18>}, {pipeline_mode = #tpu.pipeline_mode<synchronous>, transform_indices = @transform_2, window_bounds = array<i64: 107, 128>}, {pipeline_mode = #tpu.pipeline_mode<synchronous>, transform_indices = @transform_3, window_bounds = array<i64: 2, 32>}]} {
    %c0 = arith.constant 0 : index
    %c0_0 = arith.constant 0 : index
    %0 = vector.load %arg3[%c0, %c0_0] : memref<107x128xf32, #tpu.memory_space<vmem>>, vector<16x128xf32>
    %c16 = arith.constant 16 : index
    %c0_1 = arith.constant 0 : index
    %1 = vector.load %arg3[%c16, %c0_1] : memref<107x128xf32, #tpu.memory_space<vmem>>, vector<16x128xf32>
    %c32 = arith.constant 32 : index
    %c0_2 = arith.constant 0 : index
    %2 = vector.load %arg3[%c32, %c0_2] : memref<107x128xf32, #tpu.memory_space<vmem>>, vector<32x128xf32>
    %c64 = arith.constant 64 : index
    %c0_3 = arith.constant 0 : index
    %3 = vector.load %arg3[%c64, %c0_3] : memref<107x128xf32, #tpu.memory_space<vmem>>, vector<1x128xf32>
    %c72 = arith.constant 72 : index
    %c0_4 = arith.constant 0 : index
    %4 = vector.load %arg3[%c72, %c0_4] : memref<107x128xf32, #tpu.memory_space<vmem>>, vector<32x32xf32>
    %c104 = arith.constant 104 : index
    %c0_5 = arith.constant 0 : index
    %5 = vector.load %arg3[%c104, %c0_5] : memref<107x128xf32, #tpu.memory_space<vmem>>, vector<1x32xf32>
    %c105 = arith.constant 105 : index
    %c0_6 = arith.constant 0 : index
    %6 = vector.load %arg3[%c105, %c0_6] : memref<107x128xf32, #tpu.memory_space<vmem>>, vector<1x32xf32>
    %c106 = arith.constant 106 : index
    %c0_7 = arith.constant 0 : index
    %7 = vector.load %arg3[%c106, %c0_7] : memref<107x128xf32, #tpu.memory_space<vmem>>, vector<1x18xf32>
    %c0_8 = arith.constant 0 : index
    %c0_9 = arith.constant 0 : index
    %8 = vector.load %arg2[%c0_8, %c0_9] : memref<2x18xf32, #tpu.memory_space<vmem>>, vector<2x18xf32>
    %9 = vector.extract_strided_slice %8 {offsets = [0, 0], sizes = [2, 16], strides = [1, 1]} : vector<2x18xf32> to vector<2x16xf32>
    %10 = vector.extract_strided_slice %8 {offsets = [0, 16], sizes = [2, 1], strides = [1, 1]} : vector<2x18xf32> to vector<2x1xf32>
    %11 = vector.broadcast %7 : vector<1x18xf32> to vector<2x18xf32>
    %12 = arith.mulf %8, %11 : vector<2x18xf32>
    %cst = arith.constant dense<0.000000e+00> : vector<2xf32>
    %13 = vector.multi_reduction <add>, %12, %cst [1] : vector<2x18xf32> to vector<2xf32>
    %14 = vector.shape_cast %13 : vector<2xf32> to vector<2x1xf32>
    %c0_10 = arith.constant 0 : index
    %c0_11 = arith.constant 0 : index
    %c0_12 = arith.constant 0 : index
    %15 = vector.load %arg1[%c0_10, %c0_11, %c0_12] : memref<8x2x16xf32, #tpu.memory_space<vmem>>, vector<8x2x16xf32>
    %16 = vector.shape_cast %15 : vector<8x2x16xf32> to vector<16x16xf32>
    %cst_13 = arith.constant dense<0.000000e+00> : vector<2x128xf32>
    %17 = tpu.matmul %9, %1, %cst_13 {dimension_numbers = #tpu.dot_dimension_numbers<[1], [0], [0], [1], [0, 0, 1, 1], [], []>} : vector<2x16xf32>, vector<16x128xf32>, vector<2x128xf32> -> vector<2x128xf32>
    %18 = vector.broadcast %3 : vector<1x128xf32> to vector<2x128xf32>
    %19 = arith.addf %17, %18 : vector<2x128xf32>
    %cst_14 = arith.constant dense<0.000000e+00> : vector<16x128xf32>
    %20 = tpu.matmul %16, %0, %cst_14 {dimension_numbers = #tpu.dot_dimension_numbers<[1], [0], [0], [1], [0, 0, 1, 1], [], []>} : vector<16x16xf32>, vector<16x128xf32>, vector<16x128xf32> -> vector<16x128xf32>
    %21 = vector.shape_cast %20 : vector<16x128xf32> to vector<8x2x128xf32>
    %22 = vector.shape_cast %19 : vector<2x128xf32> to vector<1x2x128xf32>
    %23 = vector.broadcast %22 : vector<1x2x128xf32> to vector<8x2x128xf32>
    %24 = arith.addf %21, %23 : vector<8x2x128xf32>
    %cst_15 = arith.constant 0.000000e+00 : f32
    %25 = vector.broadcast %cst_15 : f32 to vector<2x32xf32>
    %cst_16 = arith.constant 0.000000e+00 : f32
    %26 = vector.broadcast %cst_16 : f32 to vector<2x32xf32>
    %27 = vector.extract_strided_slice %24 {offsets = [0, 0, 0], sizes = [1, 2, 128], strides = [1, 1, 1]} : vector<8x2x128xf32> to vector<1x2x128xf32>
    %28 = vector.shape_cast %27 : vector<1x2x128xf32> to vector<2x128xf32>
    %cst_17 = arith.constant dense<0.000000e+00> : vector<2x128xf32>
    %29 = tpu.matmul %25, %2, %cst_17 {dimension_numbers = #tpu.dot_dimension_numbers<[1], [0], [0], [1], [0, 0, 1, 1], [], []>} : vector<2x32xf32>, vector<32x128xf32>, vector<2x128xf32> -> vector<2x128xf32>
    %30 = arith.addf %28, %29 : vector<2x128xf32>
    %31 = arith.negf %30 : vector<2x128xf32>
    %32 = math.exp %31 : vector<2x128xf32>
    %cst_18 = arith.constant 1.000000e+00 : f32
    %33 = vector.broadcast %cst_18 : f32 to vector<2x128xf32>
    %34 = arith.addf %33, %32 : vector<2x128xf32>
    %35 = arith.divf %33, %34 : vector<2x128xf32>
    %36 = math.tanh %30 : vector<2x128xf32>
    %37 = vector.extract_strided_slice %35 {offsets = [0, 32], sizes = [2, 32], strides = [1, 1]} : vector<2x128xf32> to vector<2x32xf32>
    %38 = arith.mulf %37, %26 : vector<2x32xf32>
    %39 = vector.extract_strided_slice %35 {offsets = [0, 0], sizes = [2, 32], strides = [1, 1]} : vector<2x128xf32> to vector<2x32xf32>
    %40 = vector.extract_strided_slice %36 {offsets = [0, 64], sizes = [2, 32], strides = [1, 1]} : vector<2x128xf32> to vector<2x32xf32>
    %41 = arith.mulf %39, %40 : vector<2x32xf32>
    %42 = arith.addf %38, %41 : vector<2x32xf32>
    %43 = vector.extract_strided_slice %35 {offsets = [0, 96], sizes = [2, 32], strides = [1, 1]} : vector<2x128xf32> to vector<2x32xf32>
    %44 = math.tanh %42 : vector<2x32xf32>
    %45 = arith.mulf %43, %44 : vector<2x32xf32>
    %cst_19 = arith.constant 0.000000e+00 : f32
    %46 = vector.broadcast %cst_19 : f32 to vector<2x1xf32>
    %47 = arith.cmpf ogt, %10, %46 : vector<2x1xf32>
    %48 = arith.extui %47 : vector<2x1xi1> to vector<2x1xi32>
    %49 = arith.sitofp %48 : vector<2x1xi32> to vector<2x1xf32>
    %50 = vector.broadcast %49 : vector<2x1xf32> to vector<2x32xf32>
    %51 = arith.mulf %45, %50 : vector<2x32xf32>
    %52 = vector.broadcast %6 : vector<1x32xf32> to vector<2x32xf32>
    %53 = arith.mulf %51, %52 : vector<2x32xf32>
    %cst_20 = arith.constant dense<0.000000e+00> : vector<2xf32>
    %54 = vector.multi_reduction <add>, %53, %cst_20 [1] : vector<2x32xf32> to vector<2xf32>
    %55 = vector.shape_cast %54 : vector<2xf32> to vector<2x1xf32>
    %56 = arith.addf %55, %14 : vector<2x1xf32>
    %57 = math.tanh %56 : vector<2x1xf32>
    %58 = vector.extract_strided_slice %24 {offsets = [1, 0, 0], sizes = [1, 2, 128], strides = [1, 1, 1]} : vector<8x2x128xf32> to vector<1x2x128xf32>
    %59 = vector.shape_cast %58 : vector<1x2x128xf32> to vector<2x128xf32>
    %cst_21 = arith.constant dense<0.000000e+00> : vector<2x128xf32>
    %60 = tpu.matmul %45, %2, %cst_21 {dimension_numbers = #tpu.dot_dimension_numbers<[1], [0], [0], [1], [0, 0, 1, 1], [], []>} : vector<2x32xf32>, vector<32x128xf32>, vector<2x128xf32> -> vector<2x128xf32>
    %61 = arith.addf %59, %60 : vector<2x128xf32>
    %62 = arith.negf %61 : vector<2x128xf32>
    %63 = math.exp %62 : vector<2x128xf32>
    %cst_22 = arith.constant 1.000000e+00 : f32
    %64 = vector.broadcast %cst_22 : f32 to vector<2x128xf32>
    %65 = arith.addf %64, %63 : vector<2x128xf32>
    %66 = arith.divf %64, %65 : vector<2x128xf32>
    %67 = math.tanh %61 : vector<2x128xf32>
    %68 = vector.extract_strided_slice %66 {offsets = [0, 32], sizes = [2, 32], strides = [1, 1]} : vector<2x128xf32> to vector<2x32xf32>
    %69 = arith.mulf %68, %42 : vector<2x32xf32>
    %70 = vector.extract_strided_slice %66 {offsets = [0, 0], sizes = [2, 32], strides = [1, 1]} : vector<2x128xf32> to vector<2x32xf32>
    %71 = vector.extract_strided_slice %67 {offsets = [0, 64], sizes = [2, 32], strides = [1, 1]} : vector<2x128xf32> to vector<2x32xf32>
    %72 = arith.mulf %70, %71 : vector<2x32xf32>
    %73 = arith.addf %69, %72 : vector<2x32xf32>
    %74 = vector.extract_strided_slice %66 {offsets = [0, 96], sizes = [2, 32], strides = [1, 1]} : vector<2x128xf32> to vector<2x32xf32>
    %75 = math.tanh %73 : vector<2x32xf32>
    %76 = arith.mulf %74, %75 : vector<2x32xf32>
    %cst_23 = arith.constant 1.000000e+00 : f32
    %77 = vector.broadcast %cst_23 : f32 to vector<2x1xf32>
    %78 = arith.cmpf ogt, %10, %77 : vector<2x1xf32>
    %79 = arith.extui %78 : vector<2x1xi1> to vector<2x1xi32>
    %80 = arith.sitofp %79 : vector<2x1xi32> to vector<2x1xf32>
    %81 = vector.broadcast %80 : vector<2x1xf32> to vector<2x32xf32>
    %82 = arith.mulf %76, %81 : vector<2x32xf32>
    %83 = vector.broadcast %6 : vector<1x32xf32> to vector<2x32xf32>
    %84 = arith.mulf %82, %83 : vector<2x32xf32>
    %cst_24 = arith.constant dense<0.000000e+00> : vector<2xf32>
    %85 = vector.multi_reduction <add>, %84, %cst_24 [1] : vector<2x32xf32> to vector<2xf32>
    %86 = vector.shape_cast %85 : vector<2xf32> to vector<2x1xf32>
    %87 = arith.addf %86, %14 : vector<2x1xf32>
    %88 = math.tanh %87 : vector<2x1xf32>
    %89 = vector.extract_strided_slice %24 {offsets = [2, 0, 0], sizes = [1, 2, 128], strides = [1, 1, 1]} : vector<8x2x128xf32> to vector<1x2x128xf32>
    %90 = vector.shape_cast %89 : vector<1x2x128xf32> to vector<2x128xf32>
    %cst_25 = arith.constant dense<0.000000e+00> : vector<2x128xf32>
    %91 = tpu.matmul %76, %2, %cst_25 {dimension_numbers = #tpu.dot_dimension_numbers<[1], [0], [0], [1], [0, 0, 1, 1], [], []>} : vector<2x32xf32>, vector<32x128xf32>, vector<2x128xf32> -> vector<2x128xf32>
    %92 = arith.addf %90, %91 : vector<2x128xf32>
    %93 = arith.negf %92 : vector<2x128xf32>
    %94 = math.exp %93 : vector<2x128xf32>
    %cst_26 = arith.constant 1.000000e+00 : f32
    %95 = vector.broadcast %cst_26 : f32 to vector<2x128xf32>
    %96 = arith.addf %95, %94 : vector<2x128xf32>
    %97 = arith.divf %95, %96 : vector<2x128xf32>
    %98 = math.tanh %92 : vector<2x128xf32>
    %99 = vector.extract_strided_slice %97 {offsets = [0, 32], sizes = [2, 32], strides = [1, 1]} : vector<2x128xf32> to vector<2x32xf32>
    %100 = arith.mulf %99, %73 : vector<2x32xf32>
    %101 = vector.extract_strided_slice %97 {offsets = [0, 0], sizes = [2, 32], strides = [1, 1]} : vector<2x128xf32> to vector<2x32xf32>
    %102 = vector.extract_strided_slice %98 {offsets = [0, 64], sizes = [2, 32], strides = [1, 1]} : vector<2x128xf32> to vector<2x32xf32>
    %103 = arith.mulf %101, %102 : vector<2x32xf32>
    %104 = arith.addf %100, %103 : vector<2x32xf32>
    %105 = vector.extract_strided_slice %97 {offsets = [0, 96], sizes = [2, 32], strides = [1, 1]} : vector<2x128xf32> to vector<2x32xf32>
    %106 = math.tanh %104 : vector<2x32xf32>
    %107 = arith.mulf %105, %106 : vector<2x32xf32>
    %cst_27 = arith.constant 2.000000e+00 : f32
    %108 = vector.broadcast %cst_27 : f32 to vector<2x1xf32>
    %109 = arith.cmpf ogt, %10, %108 : vector<2x1xf32>
    %110 = arith.extui %109 : vector<2x1xi1> to vector<2x1xi32>
    %111 = arith.sitofp %110 : vector<2x1xi32> to vector<2x1xf32>
    %112 = vector.broadcast %111 : vector<2x1xf32> to vector<2x32xf32>
    %113 = arith.mulf %107, %112 : vector<2x32xf32>
    %114 = vector.broadcast %6 : vector<1x32xf32> to vector<2x32xf32>
    %115 = arith.mulf %113, %114 : vector<2x32xf32>
    %cst_28 = arith.constant dense<0.000000e+00> : vector<2xf32>
    %116 = vector.multi_reduction <add>, %115, %cst_28 [1] : vector<2x32xf32> to vector<2xf32>
    %117 = vector.shape_cast %116 : vector<2xf32> to vector<2x1xf32>
    %118 = arith.addf %117, %14 : vector<2x1xf32>
    %119 = math.tanh %118 : vector<2x1xf32>
    %120 = vector.extract_strided_slice %24 {offsets = [3, 0, 0], sizes = [1, 2, 128], strides = [1, 1, 1]} : vector<8x2x128xf32> to vector<1x2x128xf32>
    %121 = vector.shape_cast %120 : vector<1x2x128xf32> to vector<2x128xf32>
    %cst_29 = arith.constant dense<0.000000e+00> : vector<2x128xf32>
    %122 = tpu.matmul %107, %2, %cst_29 {dimension_numbers = #tpu.dot_dimension_numbers<[1], [0], [0], [1], [0, 0, 1, 1], [], []>} : vector<2x32xf32>, vector<32x128xf32>, vector<2x128xf32> -> vector<2x128xf32>
    %123 = arith.addf %121, %122 : vector<2x128xf32>
    %124 = arith.negf %123 : vector<2x128xf32>
    %125 = math.exp %124 : vector<2x128xf32>
    %cst_30 = arith.constant 1.000000e+00 : f32
    %126 = vector.broadcast %cst_30 : f32 to vector<2x128xf32>
    %127 = arith.addf %126, %125 : vector<2x128xf32>
    %128 = arith.divf %126, %127 : vector<2x128xf32>
    %129 = math.tanh %123 : vector<2x128xf32>
    %130 = vector.extract_strided_slice %128 {offsets = [0, 32], sizes = [2, 32], strides = [1, 1]} : vector<2x128xf32> to vector<2x32xf32>
    %131 = arith.mulf %130, %104 : vector<2x32xf32>
    %132 = vector.extract_strided_slice %128 {offsets = [0, 0], sizes = [2, 32], strides = [1, 1]} : vector<2x128xf32> to vector<2x32xf32>
    %133 = vector.extract_strided_slice %129 {offsets = [0, 64], sizes = [2, 32], strides = [1, 1]} : vector<2x128xf32> to vector<2x32xf32>
    %134 = arith.mulf %132, %133 : vector<2x32xf32>
    %135 = arith.addf %131, %134 : vector<2x32xf32>
    %136 = vector.extract_strided_slice %128 {offsets = [0, 96], sizes = [2, 32], strides = [1, 1]} : vector<2x128xf32> to vector<2x32xf32>
    %137 = math.tanh %135 : vector<2x32xf32>
    %138 = arith.mulf %136, %137 : vector<2x32xf32>
    %cst_31 = arith.constant 3.000000e+00 : f32
    %139 = vector.broadcast %cst_31 : f32 to vector<2x1xf32>
    %140 = arith.cmpf ogt, %10, %139 : vector<2x1xf32>
    %141 = arith.extui %140 : vector<2x1xi1> to vector<2x1xi32>
    %142 = arith.sitofp %141 : vector<2x1xi32> to vector<2x1xf32>
    %143 = vector.broadcast %142 : vector<2x1xf32> to vector<2x32xf32>
    %144 = arith.mulf %138, %143 : vector<2x32xf32>
    %145 = vector.broadcast %6 : vector<1x32xf32> to vector<2x32xf32>
    %146 = arith.mulf %144, %145 : vector<2x32xf32>
    %cst_32 = arith.constant dense<0.000000e+00> : vector<2xf32>
    %147 = vector.multi_reduction <add>, %146, %cst_32 [1] : vector<2x32xf32> to vector<2xf32>
    %148 = vector.shape_cast %147 : vector<2xf32> to vector<2x1xf32>
    %149 = arith.addf %148, %14 : vector<2x1xf32>
    %150 = math.tanh %149 : vector<2x1xf32>
    %151 = vector.extract_strided_slice %24 {offsets = [4, 0, 0], sizes = [1, 2, 128], strides = [1, 1, 1]} : vector<8x2x128xf32> to vector<1x2x128xf32>
    %152 = vector.shape_cast %151 : vector<1x2x128xf32> to vector<2x128xf32>
    %cst_33 = arith.constant dense<0.000000e+00> : vector<2x128xf32>
    %153 = tpu.matmul %138, %2, %cst_33 {dimension_numbers = #tpu.dot_dimension_numbers<[1], [0], [0], [1], [0, 0, 1, 1], [], []>} : vector<2x32xf32>, vector<32x128xf32>, vector<2x128xf32> -> vector<2x128xf32>
    %154 = arith.addf %152, %153 : vector<2x128xf32>
    %155 = arith.negf %154 : vector<2x128xf32>
    %156 = math.exp %155 : vector<2x128xf32>
    %cst_34 = arith.constant 1.000000e+00 : f32
    %157 = vector.broadcast %cst_34 : f32 to vector<2x128xf32>
    %158 = arith.addf %157, %156 : vector<2x128xf32>
    %159 = arith.divf %157, %158 : vector<2x128xf32>
    %160 = math.tanh %154 : vector<2x128xf32>
    %161 = vector.extract_strided_slice %159 {offsets = [0, 32], sizes = [2, 32], strides = [1, 1]} : vector<2x128xf32> to vector<2x32xf32>
    %162 = arith.mulf %161, %135 : vector<2x32xf32>
    %163 = vector.extract_strided_slice %159 {offsets = [0, 0], sizes = [2, 32], strides = [1, 1]} : vector<2x128xf32> to vector<2x32xf32>
    %164 = vector.extract_strided_slice %160 {offsets = [0, 64], sizes = [2, 32], strides = [1, 1]} : vector<2x128xf32> to vector<2x32xf32>
    %165 = arith.mulf %163, %164 : vector<2x32xf32>
    %166 = arith.addf %162, %165 : vector<2x32xf32>
    %167 = vector.extract_strided_slice %159 {offsets = [0, 96], sizes = [2, 32], strides = [1, 1]} : vector<2x128xf32> to vector<2x32xf32>
    %168 = math.tanh %166 : vector<2x32xf32>
    %169 = arith.mulf %167, %168 : vector<2x32xf32>
    %cst_35 = arith.constant 4.000000e+00 : f32
    %170 = vector.broadcast %cst_35 : f32 to vector<2x1xf32>
    %171 = arith.cmpf ogt, %10, %170 : vector<2x1xf32>
    %172 = arith.extui %171 : vector<2x1xi1> to vector<2x1xi32>
    %173 = arith.sitofp %172 : vector<2x1xi32> to vector<2x1xf32>
    %174 = vector.broadcast %173 : vector<2x1xf32> to vector<2x32xf32>
    %175 = arith.mulf %169, %174 : vector<2x32xf32>
    %176 = vector.broadcast %6 : vector<1x32xf32> to vector<2x32xf32>
    %177 = arith.mulf %175, %176 : vector<2x32xf32>
    %cst_36 = arith.constant dense<0.000000e+00> : vector<2xf32>
    %178 = vector.multi_reduction <add>, %177, %cst_36 [1] : vector<2x32xf32> to vector<2xf32>
    %179 = vector.shape_cast %178 : vector<2xf32> to vector<2x1xf32>
    %180 = arith.addf %179, %14 : vector<2x1xf32>
    %181 = math.tanh %180 : vector<2x1xf32>
    %182 = vector.extract_strided_slice %24 {offsets = [5, 0, 0], sizes = [1, 2, 128], strides = [1, 1, 1]} : vector<8x2x128xf32> to vector<1x2x128xf32>
    %183 = vector.shape_cast %182 : vector<1x2x128xf32> to vector<2x128xf32>
    %cst_37 = arith.constant dense<0.000000e+00> : vector<2x128xf32>
    %184 = tpu.matmul %169, %2, %cst_37 {dimension_numbers = #tpu.dot_dimension_numbers<[1], [0], [0], [1], [0, 0, 1, 1], [], []>} : vector<2x32xf32>, vector<32x128xf32>, vector<2x128xf32> -> vector<2x128xf32>
    %185 = arith.addf %183, %184 : vector<2x128xf32>
    %186 = arith.negf %185 : vector<2x128xf32>
    %187 = math.exp %186 : vector<2x128xf32>
    %cst_38 = arith.constant 1.000000e+00 : f32
    %188 = vector.broadcast %cst_38 : f32 to vector<2x128xf32>
    %189 = arith.addf %188, %187 : vector<2x128xf32>
    %190 = arith.divf %188, %189 : vector<2x128xf32>
    %191 = math.tanh %185 : vector<2x128xf32>
    %192 = vector.extract_strided_slice %190 {offsets = [0, 32], sizes = [2, 32], strides = [1, 1]} : vector<2x128xf32> to vector<2x32xf32>
    %193 = arith.mulf %192, %166 : vector<2x32xf32>
    %194 = vector.extract_strided_slice %190 {offsets = [0, 0], sizes = [2, 32], strides = [1, 1]} : vector<2x128xf32> to vector<2x32xf32>
    %195 = vector.extract_strided_slice %191 {offsets = [0, 64], sizes = [2, 32], strides = [1, 1]} : vector<2x128xf32> to vector<2x32xf32>
    %196 = arith.mulf %194, %195 : vector<2x32xf32>
    %197 = arith.addf %193, %196 : vector<2x32xf32>
    %198 = vector.extract_strided_slice %190 {offsets = [0, 96], sizes = [2, 32], strides = [1, 1]} : vector<2x128xf32> to vector<2x32xf32>
    %199 = math.tanh %197 : vector<2x32xf32>
    %200 = arith.mulf %198, %199 : vector<2x32xf32>
    %cst_39 = arith.constant 5.000000e+00 : f32
    %201 = vector.broadcast %cst_39 : f32 to vector<2x1xf32>
    %202 = arith.cmpf ogt, %10, %201 : vector<2x1xf32>
    %203 = arith.extui %202 : vector<2x1xi1> to vector<2x1xi32>
    %204 = arith.sitofp %203 : vector<2x1xi32> to vector<2x1xf32>
    %205 = vector.broadcast %204 : vector<2x1xf32> to vector<2x32xf32>
    %206 = arith.mulf %200, %205 : vector<2x32xf32>
    %207 = vector.broadcast %6 : vector<1x32xf32> to vector<2x32xf32>
    %208 = arith.mulf %206, %207 : vector<2x32xf32>
    %cst_40 = arith.constant dense<0.000000e+00> : vector<2xf32>
    %209 = vector.multi_reduction <add>, %208, %cst_40 [1] : vector<2x32xf32> to vector<2xf32>
    %210 = vector.shape_cast %209 : vector<2xf32> to vector<2x1xf32>
    %211 = arith.addf %210, %14 : vector<2x1xf32>
    %212 = math.tanh %211 : vector<2x1xf32>
    %213 = vector.extract_strided_slice %24 {offsets = [6, 0, 0], sizes = [1, 2, 128], strides = [1, 1, 1]} : vector<8x2x128xf32> to vector<1x2x128xf32>
    %214 = vector.shape_cast %213 : vector<1x2x128xf32> to vector<2x128xf32>
    %cst_41 = arith.constant dense<0.000000e+00> : vector<2x128xf32>
    %215 = tpu.matmul %200, %2, %cst_41 {dimension_numbers = #tpu.dot_dimension_numbers<[1], [0], [0], [1], [0, 0, 1, 1], [], []>} : vector<2x32xf32>, vector<32x128xf32>, vector<2x128xf32> -> vector<2x128xf32>
    %216 = arith.addf %214, %215 : vector<2x128xf32>
    %217 = arith.negf %216 : vector<2x128xf32>
    %218 = math.exp %217 : vector<2x128xf32>
    %cst_42 = arith.constant 1.000000e+00 : f32
    %219 = vector.broadcast %cst_42 : f32 to vector<2x128xf32>
    %220 = arith.addf %219, %218 : vector<2x128xf32>
    %221 = arith.divf %219, %220 : vector<2x128xf32>
    %222 = math.tanh %216 : vector<2x128xf32>
    %223 = vector.extract_strided_slice %221 {offsets = [0, 32], sizes = [2, 32], strides = [1, 1]} : vector<2x128xf32> to vector<2x32xf32>
    %224 = arith.mulf %223, %197 : vector<2x32xf32>
    %225 = vector.extract_strided_slice %221 {offsets = [0, 0], sizes = [2, 32], strides = [1, 1]} : vector<2x128xf32> to vector<2x32xf32>
    %226 = vector.extract_strided_slice %222 {offsets = [0, 64], sizes = [2, 32], strides = [1, 1]} : vector<2x128xf32> to vector<2x32xf32>
    %227 = arith.mulf %225, %226 : vector<2x32xf32>
    %228 = arith.addf %224, %227 : vector<2x32xf32>
    %229 = vector.extract_strided_slice %221 {offsets = [0, 96], sizes = [2, 32], strides = [1, 1]} : vector<2x128xf32> to vector<2x32xf32>
    %230 = math.tanh %228 : vector<2x32xf32>
    %231 = arith.mulf %229, %230 : vector<2x32xf32>
    %cst_43 = arith.constant 6.000000e+00 : f32
    %232 = vector.broadcast %cst_43 : f32 to vector<2x1xf32>
    %233 = arith.cmpf ogt, %10, %232 : vector<2x1xf32>
    %234 = arith.extui %233 : vector<2x1xi1> to vector<2x1xi32>
    %235 = arith.sitofp %234 : vector<2x1xi32> to vector<2x1xf32>
    %236 = vector.broadcast %235 : vector<2x1xf32> to vector<2x32xf32>
    %237 = arith.mulf %231, %236 : vector<2x32xf32>
    %238 = vector.broadcast %6 : vector<1x32xf32> to vector<2x32xf32>
    %239 = arith.mulf %237, %238 : vector<2x32xf32>
    %cst_44 = arith.constant dense<0.000000e+00> : vector<2xf32>
    %240 = vector.multi_reduction <add>, %239, %cst_44 [1] : vector<2x32xf32> to vector<2xf32>
    %241 = vector.shape_cast %240 : vector<2xf32> to vector<2x1xf32>
    %242 = arith.addf %241, %14 : vector<2x1xf32>
    %243 = math.tanh %242 : vector<2x1xf32>
    %244 = vector.extract_strided_slice %24 {offsets = [7, 0, 0], sizes = [1, 2, 128], strides = [1, 1, 1]} : vector<8x2x128xf32> to vector<1x2x128xf32>
    %245 = vector.shape_cast %244 : vector<1x2x128xf32> to vector<2x128xf32>
    %cst_45 = arith.constant dense<0.000000e+00> : vector<2x128xf32>
    %246 = tpu.matmul %231, %2, %cst_45 {dimension_numbers = #tpu.dot_dimension_numbers<[1], [0], [0], [1], [0, 0, 1, 1], [], []>} : vector<2x32xf32>, vector<32x128xf32>, vector<2x128xf32> -> vector<2x128xf32>
    %247 = arith.addf %245, %246 : vector<2x128xf32>
    %248 = arith.negf %247 : vector<2x128xf32>
    %249 = math.exp %248 : vector<2x128xf32>
    %cst_46 = arith.constant 1.000000e+00 : f32
    %250 = vector.broadcast %cst_46 : f32 to vector<2x128xf32>
    %251 = arith.addf %250, %249 : vector<2x128xf32>
    %252 = arith.divf %250, %251 : vector<2x128xf32>
    %253 = math.tanh %247 : vector<2x128xf32>
    %254 = vector.extract_strided_slice %252 {offsets = [0, 32], sizes = [2, 32], strides = [1, 1]} : vector<2x128xf32> to vector<2x32xf32>
    %255 = arith.mulf %254, %228 : vector<2x32xf32>
    %256 = vector.extract_strided_slice %252 {offsets = [0, 0], sizes = [2, 32], strides = [1, 1]} : vector<2x128xf32> to vector<2x32xf32>
    %257 = vector.extract_strided_slice %253 {offsets = [0, 64], sizes = [2, 32], strides = [1, 1]} : vector<2x128xf32> to vector<2x32xf32>
    %258 = arith.mulf %256, %257 : vector<2x32xf32>
    %259 = arith.addf %255, %258 : vector<2x32xf32>
    %260 = vector.extract_strided_slice %252 {offsets = [0, 96], sizes = [2, 32], strides = [1, 1]} : vector<2x128xf32> to vector<2x32xf32>
    %261 = math.tanh %259 : vector<2x32xf32>
    %262 = arith.mulf %260, %261 : vector<2x32xf32>
    %cst_47 = arith.constant 7.000000e+00 : f32
    %263 = vector.broadcast %cst_47 : f32 to vector<2x1xf32>
    %264 = arith.cmpf ogt, %10, %263 : vector<2x1xf32>
    %265 = arith.extui %264 : vector<2x1xi1> to vector<2x1xi32>
    %266 = arith.sitofp %265 : vector<2x1xi32> to vector<2x1xf32>
    %267 = vector.broadcast %266 : vector<2x1xf32> to vector<2x32xf32>
    %268 = arith.mulf %262, %267 : vector<2x32xf32>
    %269 = vector.broadcast %6 : vector<1x32xf32> to vector<2x32xf32>
    %270 = arith.mulf %268, %269 : vector<2x32xf32>
    %cst_48 = arith.constant dense<0.000000e+00> : vector<2xf32>
    %271 = vector.multi_reduction <add>, %270, %cst_48 [1] : vector<2x32xf32> to vector<2xf32>
    %272 = vector.shape_cast %271 : vector<2xf32> to vector<2x1xf32>
    %273 = arith.addf %272, %14 : vector<2x1xf32>
    %274 = math.tanh %273 : vector<2x1xf32>
    %275 = arith.maximumf %57, %88 : vector<2x1xf32>
    %276 = arith.maximumf %275, %119 : vector<2x1xf32>
    %277 = arith.maximumf %276, %150 : vector<2x1xf32>
    %278 = arith.maximumf %277, %181 : vector<2x1xf32>
    %279 = arith.maximumf %278, %212 : vector<2x1xf32>
    %280 = arith.maximumf %279, %243 : vector<2x1xf32>
    %281 = arith.maximumf %280, %274 : vector<2x1xf32>
    %282 = arith.subf %57, %281 : vector<2x1xf32>
    %283 = math.exp %282 : vector<2x1xf32>
    %284 = vector.broadcast %283 : vector<2x1xf32> to vector<2x32xf32>
    %285 = arith.mulf %284, %51 : vector<2x32xf32>
    %286 = arith.subf %88, %281 : vector<2x1xf32>
    %287 = math.exp %286 : vector<2x1xf32>
    %288 = arith.addf %283, %287 : vector<2x1xf32>
    %289 = vector.broadcast %287 : vector<2x1xf32> to vector<2x32xf32>
    %290 = arith.mulf %289, %82 : vector<2x32xf32>
    %291 = arith.addf %285, %290 : vector<2x32xf32>
    %292 = arith.subf %119, %281 : vector<2x1xf32>
    %293 = math.exp %292 : vector<2x1xf32>
    %294 = arith.addf %288, %293 : vector<2x1xf32>
    %295 = vector.broadcast %293 : vector<2x1xf32> to vector<2x32xf32>
    %296 = arith.mulf %295, %113 : vector<2x32xf32>
    %297 = arith.addf %291, %296 : vector<2x32xf32>
    %298 = arith.subf %150, %281 : vector<2x1xf32>
    %299 = math.exp %298 : vector<2x1xf32>
    %300 = arith.addf %294, %299 : vector<2x1xf32>
    %301 = vector.broadcast %299 : vector<2x1xf32> to vector<2x32xf32>
    %302 = arith.mulf %301, %144 : vector<2x32xf32>
    %303 = arith.addf %297, %302 : vector<2x32xf32>
    %304 = arith.subf %181, %281 : vector<2x1xf32>
    %305 = math.exp %304 : vector<2x1xf32>
    %306 = arith.addf %300, %305 : vector<2x1xf32>
    %307 = vector.broadcast %305 : vector<2x1xf32> to vector<2x32xf32>
    %308 = arith.mulf %307, %175 : vector<2x32xf32>
    %309 = arith.addf %303, %308 : vector<2x32xf32>
    %310 = arith.subf %212, %281 : vector<2x1xf32>
    %311 = math.exp %310 : vector<2x1xf32>
    %312 = arith.addf %306, %311 : vector<2x1xf32>
    %313 = vector.broadcast %311 : vector<2x1xf32> to vector<2x32xf32>
    %314 = arith.mulf %313, %206 : vector<2x32xf32>
    %315 = arith.addf %309, %314 : vector<2x32xf32>
    %316 = arith.subf %243, %281 : vector<2x1xf32>
    %317 = math.exp %316 : vector<2x1xf32>
    %318 = arith.addf %312, %317 : vector<2x1xf32>
    %319 = vector.broadcast %317 : vector<2x1xf32> to vector<2x32xf32>
    %320 = arith.mulf %319, %237 : vector<2x32xf32>
    %321 = arith.addf %315, %320 : vector<2x32xf32>
    %322 = arith.subf %274, %281 : vector<2x1xf32>
    %323 = math.exp %322 : vector<2x1xf32>
    %324 = arith.addf %318, %323 : vector<2x1xf32>
    %325 = vector.broadcast %323 : vector<2x1xf32> to vector<2x32xf32>
    %326 = arith.mulf %325, %268 : vector<2x32xf32>
    %327 = arith.addf %321, %326 : vector<2x32xf32>
    %328 = vector.broadcast %324 : vector<2x1xf32> to vector<2x32xf32>
    %329 = arith.divf %327, %328 : vector<2x32xf32>
    %cst_49 = arith.constant dense<0.000000e+00> : vector<2x32xf32>
    %330 = tpu.matmul %329, %4, %cst_49 {dimension_numbers = #tpu.dot_dimension_numbers<[1], [0], [0], [1], [0, 0, 1, 1], [], []>} : vector<2x32xf32>, vector<32x32xf32>, vector<2x32xf32> -> vector<2x32xf32>
    %331 = vector.broadcast %5 : vector<1x32xf32> to vector<2x32xf32>
    %332 = arith.addf %330, %331 : vector<2x32xf32>
    %c0_50 = arith.constant 0 : index
    %c0_51 = arith.constant 0 : index
    %333 = vector.load %arg4[%c0_50, %c0_51] : memref<2x32xf32, #tpu.memory_space<vmem>>, vector<2x32xf32>
    tpu.vector_store %arg4[%c0_50, %c0_51], %332 {strides = array<i32>} : memref<2x32xf32, #tpu.memory_space<vmem>>, vector<2x32xf32>,
    return
  }
  func.func @transform_0(%arg0: i32) -> (i32, i32, i32) {
    %c0_i32 = arith.constant 0 : i32
    %c0_i32_0 = arith.constant 0 : i32
    %c0_i32_1 = arith.constant 0 : i32
    %c0_i32_2 = arith.constant 0 : i32
    return %c0_i32, %c0_i32_0, %c0_i32_1 : i32, i32, i32
  }
  func.func @transform_1(%arg0: i32) -> (i32, i32) {
    %c0_i32 = arith.constant 0 : i32
    %c0_i32_0 = arith.constant 0 : i32
    %c0_i32_1 = arith.constant 0 : i32
    return %c0_i32, %c0_i32_0 : i32, i32
  }
  func.func @transform_2(%arg0: i32) -> (i32, i32) {
    %c0_i32 = arith.constant 0 : i32
    %c0_i32_0 = arith.constant 0 : i32
    %c0_i32_1 = arith.constant 0 : i32
    return %c0_i32, %c0_i32_0 : i32, i32
  }
  func.func @transform_3(%arg0: i32) -> (i32, i32) {
    %c0_i32 = arith.constant 0 : i32
    %c0_i32_0 = arith.constant 0 : i32
    %c0_i32_1 = arith.constant 0 : i32
    return %c0_i32, %c0_i32_0 : i32, i32
  }
}

</mosaic_0001>

<bundles_post_ra>
// kernel: ae_lstm_forward.1
= control target key start
LH: loop header
LB: loop body
LE: loop exit
PB: predicated region body
PF: predicated region fallthrough
CT: control target
= control target key end

     0   :  { %v2012_v2 = vmov 0.0|0.0   ;;  %vm2013_vm0 = vmmov 0   ;;  %v2014_v4 = vmov 0.0   ;;  %v140_v8 = vlaneseq  ;;  %s2380_s0 = inlined_call_operand.vmem [shape: f32[8,2,16], index: 0, kind: input, shape index: {}]   ;;  %s2381_s1 = inlined_call_operand.vmem [shape: f32[2,18], index: 1, kind: input, shape index: {}]   ;;  %s2382_s2 = inlined_call_operand.vmem [shape: f32[107,128], index: 2, kind: input, shape index: {}]   ;;  %s2383_s3 = inlined_call_operand.hbm [shape: f32[2,32], index: 3, kind: output, shape index: {}]  }
   0x1   :  { %v17_v0 = vld [vmem:[%s2382_s2 + $0x10] sm:$0xff]  ;;  %v18_v1 = vld [vmem:[%s2382_s2 + $0x18] sm:$0xff]  ;;  %1803 = vmatprep.subr.bf16.mxu1 %v2012_v2  ;;  %1694 = vmatprep.mubr.msk.f32.mxu1 %vm2013_vm0, %v2014_v4  ;;  %v2053_v5 = vld [vmem:[%s2381_s1] sm:$0x3]  ;;  %vm53_vm1 = vcmask 130048  }
   0x2   :  { %v1804_v3 = vpack.c.bf16 %v18_v1, %v17_v0  ;;  %v15_v6 = vld [vmem:[%s2382_s2] sm:$0xff]  ;;  %v16_v7 = vld [vmem:[%s2382_s2 + $0x8] sm:$0xff]  ;;  %1810 = vmatprep.subr.bf16.mxu0 %v2012_v2  ;;  %v2015_v13 = vmov 1983009808   ;;  %1712 = vmatprep.mubr.msk.f32.mxu0 %vm2013_vm0, %v2014_v4  ;;  %v141_v22 = vshrl.u32 %v140_v8, 7  ;;  %v21_v25 = vld [vmem:[%s2382_s2 + $0x30] sm:$0xff] }
   0x3   :  { %v1806_v9 = vpack.c.bf16 %v16_v7, %v15_v6  ;;  %v19_v10 = vld [vmem:[%s2382_s2 + $0x20] sm:$0xff]  ;;  %v20_v11 = vld [vmem:[%s2382_s2 + $0x28] sm:$0xff]  ;;  %v138_v14 = vunpack.c.l.s4 %v2015_v13  ;;  %v22_v29 = vld [vmem:[%s2382_s2 + $0x38] sm:$0xff] }
   0x4   :  { %v41_v12 = vld [vmem:[%s2380_s0] sm:$0x3]  ;;  %1805 = vmatpush3.bf16.msra.mxu1 %v1804_v3  ;;  %v2073_v15 = vpack.c.bf16 %v20_v11, %v19_v10  ;;  %v42_v16 = vld [vmem:[%s2380_s0 + $0x2] sm:$0x3]  ;;  %v43_v17 = vld [vmem:[%s2380_s0 + $0x4] sm:$0x3]  ;;  %v2108_v32 = vpack.c.bf16 %v22_v29, %v21_v25 }
   0x5   :  { %v44_v18 = vld [vmem:[%s2380_s0 + $0x6] sm:$0x3]  ;;  %1807 = vmatprep.subr.bf16.mxu1 %v1806_v9  ;;  %v135_v19 = vcombine.low %v41_v12, %v42_v16  ;;  %v139_v21 = vunpack.c.0.s8 %v138_v14  ;;  %v45_v23 = vld [vmem:[%s2380_s0 + $0x8] sm:$0x3]  ;;  %v46_v24 = vld [vmem:[%s2380_s0 + $0xa] sm:$0x3] }
   0x6   :  { %v136_v20 = vcombine.low %v43_v17, %v44_v18  ;;  %1812 = vmatpush3.bf16.msra.mxu0 %v2073_v15  ;;  %v47_v26 = vld [vmem:[%s2380_s0 + $0xc] sm:$0x3]  ;;  %v48_v27 = vld [vmem:[%s2380_s0 + $0xe] sm:$0x3]  ;;  %v152_v28 = vcombine.low %v45_v23, %v46_v24 }
   0x7   :  { %1695 = vmatmul.mubr.msk.f32.vlgmr.msra.gmra.mrb[0].mxu1 %vm53_vm1, %v2053_v5  ;;  %v2105_v30 = vsub.s32 %v139_v21, %v141_v22  ;;  %v153_v31 = vcombine.low %v47_v26, %v48_v27  ;;  %1813 = vmatprep.subr.bf16.mxu0 %v2012_v2 }
   0x8   :  { %8 = vsyncpa [#allocation3], 0  ;;  %1809 = vmatpush3.bf16.msra.mxu1 %v1806_v9  ;;  %v1608_v41 = vld [vmem:[%s2382_s2 + $0x40] ss:$0 sm:$0xff]  ;;  %s2016_s19 = smov 64   ;;  %s2017_s20 = smov 32  }
   0x9   :  { %v143_v33 = vrot.slane %v135_v19, %v2105_v30  ;;  %v150_v34 = vrot.slane %v136_v20, %v2105_v30  ;;  %v160_v35 = vrot.slane %v152_v28, %v2105_v30  ;;  %v167_v36 = vrot.slane %v153_v31, %v2105_v30  ;;  %1816 = vmatprep.subr.bf16.mxu1 %v2012_v2  ;;  %s2019_s23 = smov 96   ;;  %s2020_s8 = smov [#allocation2]  }
   0xa   :  { %1815 = vmatpush3.bf16.msra.mxu0 %v2108_v32  ;;  %vm300_vm2 = vcmask 261120   ;;  %vm399_vm3 = vcmp.gt.f32.partialorder %v2053_v5, 0.0  ;;  %vm548_vm4 = vcmp.gt.f32.partialorder %v2053_v5, 1.0  ;;  %vm1346_vm5 = vcmp.gt.f32.partialorder %v2053_v5, 7.0  ;;  %s1599_s9 = sshll.u32 %s2020_s8, 4  ;;  %s1600_s9 = int_to_ptr.vmem [resolvable:$true] %s1599_s9 }
   0xb   :  { %v151_v37 = vcombine.low %v143_v33, %v150_v34  ;;  %v168_v38 = vcombine.low %v160_v35, %v167_v36  ;;  %1822 = vmatprep.subr.bf16.mxu0 %v2012_v2  ;;  %vm681_vm6 = vcmp.gt.f32.partialorder %v2053_v5, 2.0  ;;  %vm814_vm7 = vcmp.gt.f32.partialorder %v2053_v5, 3.0  ;;  %s1988_s10 = scalar_lea.vmem %s1600_s9, 32  ;;  %p1993_p1 = scmp.lt.s32.totalorder %s1600_s9, %s1600_s9 }
   0xc   :  { %vm947_vm8 = vcmp.gt.f32.partialorder %v2053_v5, 4.0  ;;  %vm1080_vm9 = vcmp.gt.f32.partialorder %v2053_v5, 5.0  ;;  %vm1213_vm10 = vcmp.gt.f32.partialorder %v2053_v5, 6.0  ;;  %vm37_vm11 = vcmask 140288   ;;  %p1989_p0 = scmp.ne.s32.totalorder %s1600_s9, %s1988_s10  ;;  %p1994_p2 = scmp.lt.s32.totalorder %s1988_s10, %s1988_s10 }
   0xd   :  { %1701 = vmatprep.mubr.msk.f32.mxu1 %vm53_vm1, %v151_v37  ;;  %1713 = vmatmul.mubr.f32.vlgmr.msra.gmra.mrb[0].mxu0 %v2014_v4  ;;  %vm435_vm12 = vcmask 254976  }
   0xe   :  { %1702 = vmatmul.mubr.msk.f32.vlgmr.msra.gmra.mrb[2].mxu1 %vm53_vm1, %v168_v38  ;;  %1824 = vmatpush3.bf16.msra.mxu0 %v2073_v15  ;;  %p1995_p3 = por %p1994_p2, %p1993_p1 }
   0xf   :  { %1818 = vmatpush3.bf16.msra.mxu1 %v2073_v15  ;;  %1723 = vmatprep.mubr.msk.f32.mxu1 %vm2013_vm0, %v2014_v4 }
  0x10   :  { %1819 = vmatprep.subr.bf16.mxu1 %v2012_v2  ;;  %1825 = vmatprep.subr.bf16.mxu0 %v2012_v2  ;;  %p1996_p4 = pnand %p1995_p3, %p1989_p0 }
  0x11   :  { %1734 = vmatprep.mubr.msk.f32.mxu0 %vm2013_vm0, %v2014_v4 }
  0x12   :  { %1827 = vmatpush3.bf16.msra.mxu0 %v2108_v32 }
  0x13   :  { %1821 = vmatpush3.bf16.msra.mxu1 %v2108_v32  ;;  %1834 = vmatprep.subr.bf16.mxu0 %v2012_v2 }
  0x14   :  { %1828 = vmatprep.subr.bf16.mxu1 %v2012_v2 }
  0xda   :  { %v123_v39 = vpop.f32.mrb[0].mxu1 }
  0xdb   :  { %v1696_v40 = vpop.f32.mrb[1].mxu1  ;;  %v124_v45 = vadd.f32 %v1608_v41, %v123_v39 }
  0xe0   :  { %v370_v42 = vpop.f32.mrb[0].mxu0 }
  0xe1   :  { %v1703_v43 = vpop.f32.mrb[2].mxu1  ;;  %v1714_v44 = vpop.f32.mrb[1].mxu0 }
  0xe2   :  { %v267_v46 = vcombine.high %v1703_v43, %v1703_v43  ;;  %v274_v47 = vrot.slane %v1703_v43, %v2105_v30  ;;  %v239_v48 = vpop.f32.mrb[3].mxu1 }
  0xe3   :  { %v250_v49 = vcombine.high %v239_v48, %v239_v48  ;;  %v257_v50 = vrot.slane %v239_v48, %v2105_v30 }
  0xe4   :  { %v281_v51 = vrot.slane %v267_v46, %v2105_v30  ;;  %v282_v52 = vcombine.high %v274_v47, %v274_v47  ;;  %v2138_v53 = vadd.f32 %v274_v47, %v124_v45 }
  0xe5   :  { %v264_v54 = vrot.slane %v250_v49, %v2105_v30  ;;  %v265_v55 = vcombine.high %v257_v50, %v257_v50  ;;  %v292_v56 = vadd.f32 %v257_v50, %v124_v45 }
  0xe6   :  { %v2141_v57 = vadd.f32 %v282_v52, %v124_v45  ;;  %v2143_v58 = vadd.f32 %v281_v51, %v124_v45  ;;  %v283_v59 = vcombine.high %v281_v51, %v281_v51 }
  0xe7   :  { %v374_v60 = vadd.f32 %v370_v42, %v292_v56  ;;  %v293_v61 = vadd.f32 %v265_v55, %v124_v45  ;;  %v2145_v62 = vadd.f32 %v264_v54, %v124_v45  ;;  %v266_v63 = vcombine.high %v264_v54, %v264_v54 }
  0xe8   :  { %v2147_v0 = vadd.f32 %v283_v59, %v124_v45 }
  0xe9   :  { %1890 = vtanh.f32 %v374_v60  ;;  %v2149_v1 = vadd.f32 %v266_v63, %v124_v45  ;;  %v1612_v6 = vmul.f32 -1.442695, %v374_v60 }
  0xeb   :  { %1892 = vpow2.f32 %v1612_v6 }
  0xf3   :  { %v1891_v3 = vpop.eup %1890 }
  0xf4   :  { %384 = vrot.lane.b32.xlu0 %v1891_v3, %s2016_s19 }
  0xf5   :  { %v1893_v7 = vpop.eup %1892 }
  0xf6   :  { %v378_v8 = vadd.f32 1.0, %v1893_v7 }
  0xf8   :  { %1894 = vrcp.f32 %v378_v8 }
 0x102   :  { %v1895_v9 = vpop.eup %1894 }
 0x103   :  { %v382_v12 = vmul.f32 0.0, %v1895_v9 }
 0x166   :  { %v385_v10 = vpop.permute.xlu0 %384 }
 0x167   :  { %v387_v11 = vmul.f32 %v1895_v9, %v385_v10 }
 0x169   :  { %389 = vrot.lane.b32.xlu0 %v387_v11, %s2017_s20 }
 0x1db   :  { %v390_v13 = vpop.permute.xlu0 %389 }
 0x1dc   :  { %v392_v14 = vadd.f32 %v390_v13, %v382_v12 }
 0x1de   :  { %1896 = vtanh.f32 %v392_v14 }
 0x1e8   :  { %v1897_v16 = vpop.eup %1896 }
 0x1e9   :  { %395 = vrot.lane.b32.xlu1 %v1897_v16, %s2016_s19 }
 0x25b   :  { %v396_v17 = vpop.permute.xlu1 %395 }
 0x25c   :  { %v2154_v18 = vmul.f32 %v1895_v9, %v396_v17 }
 0x25e   :  { %v448_v19 = vrot.slane %v2154_v18, %v2105_v30 }
 0x260   :  { %449 = vrot.lane.b32.xlu1 %v448_v19, %s2017_s20 }
 0x2d2   :  { %v450_v20 = vpop.permute.xlu1 %449 }
 0x2d3   :  { %1724 = vmatmul.mubr.msk.f32.vlgmr.msra.gmra.mrb[4].mxu1 %vm300_vm2, %v450_v20 }
 0x2d4   :  { %1830 = vmatpush3.bf16.msra.mxu1 %v2073_v15  ;;  %1745 = vmatprep.mubr.msk.f32.mxu1 %vm2013_vm0, %v2014_v4 }
 0x2d5   :  { %1831 = vmatprep.subr.bf16.mxu1 %v2012_v2 }
 0x2d8   :  { %1833 = vmatpush3.bf16.msra.mxu1 %v2108_v32 }
 0x2d9   :  { %1840 = vmatprep.subr.bf16.mxu1 %v2012_v2 }
 0x3a6   :  { %v519_v21 = vpop.f32.mrb[4].mxu1 }
 0x3a7   :  { %v523_v22 = vadd.f32 %v519_v21, %v293_v61  ;;  %v1725_v23 = vpop.f32.mrb[5].mxu1 }
 0x3a9   :  { %1898 = vtanh.f32 %v523_v22  ;;  %v1616_v25 = vmul.f32 -1.442695, %v523_v22 }
 0x3ab   :  { %1900 = vpow2.f32 %v1616_v25 }
 0x3b3   :  { %v1899_v24 = vpop.eup %1898 }
 0x3b4   :  { %533 = vrot.lane.b32.xlu0 %v1899_v24, %s2016_s19 }
 0x3b5   :  { %v1901_v26 = vpop.eup %1900 }
 0x3b6   :  { %v527_v27 = vadd.f32 1.0, %v1901_v26 }
 0x3b8   :  { %1902 = vrcp.f32 %v527_v27 }
 0x3c2   :  { %v1903_v28 = vpop.eup %1902 }
 0x3c3   :  { %v531_v33 = vmul.f32 %v1903_v28, %v392_v14 }
 0x426   :  { %v534_v29 = vpop.permute.xlu0 %533 }
 0x427   :  { %v536_v31 = vmul.f32 %v1903_v28, %v534_v29 }
 0x429   :  { %538 = vrot.lane.b32.xlu1 %v536_v31, %s2017_s20 }
 0x49b   :  { %v539_v34 = vpop.permute.xlu1 %538 }
 0x49c   :  { %v541_v35 = vadd.f32 %v539_v34, %v531_v33 }
 0x49e   :  { %1904 = vtanh.f32 %v541_v35 }
 0x4a8   :  { %v1905_v36 = vpop.eup %1904 }
 0x4a9   :  { %544 = vrot.lane.b32.xlu0 %v1905_v36, %s2016_s19 }
 0x51b   :  { %v545_v37 = vpop.permute.xlu0 %544 }
 0x51c   :  { %v2169_v38 = vmul.f32 %v1903_v28, %v545_v37 }
 0x51e   :  { %v581_v39 = vrot.slane %v2169_v38, %v2105_v30 }
 0x520   :  { %582 = vrot.lane.b32.xlu1 %v581_v39, %s2017_s20 }
 0x592   :  { %v583_v40 = vpop.permute.xlu1 %582 }
 0x593   :  { %1735 = vmatmul.mubr.msk.f32.vlgmr.msra.gmra.mrb[2].mxu0 %vm300_vm2, %v583_v40 }
 0x594   :  { %1836 = vmatpush3.bf16.msra.mxu0 %v2073_v15  ;;  %1756 = vmatprep.mubr.msk.f32.mxu0 %vm2013_vm0, %v2014_v4 }
 0x595   :  { %1837 = vmatprep.subr.bf16.mxu0 %v2012_v2 }
 0x598   :  { %1839 = vmatpush3.bf16.msra.mxu0 %v2108_v32 }
 0x599   :  { %1846 = vmatprep.subr.bf16.mxu0 %v2012_v2 }
 0x666   :  { %v652_v41 = vpop.f32.mrb[2].mxu0 }
 0x667   :  { %v656_v42 = vadd.f32 %v652_v41, %v2145_v62  ;;  %v1736_v43 = vpop.f32.mrb[3].mxu0 }
 0x669   :  { %1906 = vtanh.f32 %v656_v42  ;;  %v1619_v45 = vmul.f32 -1.442695, %v656_v42 }
 0x66b   :  { %1908 = vpow2.f32 %v1619_v45 }
 0x673   :  { %v1907_v44 = vpop.eup %1906 }
 0x674   :  { %666 = vrot.lane.b32.xlu0 %v1907_v44, %s2016_s19 }
 0x675   :  { %v1909_v46 = vpop.eup %1908 }
 0x676   :  { %v660_v47 = vadd.f32 1.0, %v1909_v46 }
 0x678   :  { %1910 = vrcp.f32 %v660_v47 }
 0x682   :  { %v1911_v48 = vpop.eup %1910 }
 0x683   :  { %v664_v51 = vmul.f32 %v1911_v48, %v541_v35 }
 0x6e6   :  { %v667_v49 = vpop.permute.xlu0 %666 }
 0x6e7   :  { %v669_v50 = vmul.f32 %v1911_v48, %v667_v49 }
 0x6e9   :  { %671 = vrot.lane.b32.xlu1 %v669_v50, %s2017_s20 }
 0x75b   :  { %v672_v52 = vpop.permute.xlu1 %671 }
 0x75c   :  { %v674_v54 = vadd.f32 %v672_v52, %v664_v51 }
 0x75e   :  { %1912 = vtanh.f32 %v674_v54 }
 0x768   :  { %v1913_v55 = vpop.eup %1912 }
 0x769   :  { %677 = vrot.lane.b32.xlu0 %v1913_v55, %s2016_s19 }
 0x7db   :  { %v678_v56 = vpop.permute.xlu0 %677 }
 0x7dc   :  { %v2185_v59 = vmul.f32 %v1911_v48, %v678_v56 }
 0x7de   :  { %v714_v60 = vrot.slane %v2185_v59, %v2105_v30 }
 0x7e0   :  { %715 = vrot.lane.b32.xlu1 %v714_v60, %s2017_s20 }
 0x852   :  { %v716_v61 = vpop.permute.xlu1 %715 }
 0x853   :  { %1746 = vmatmul.mubr.msk.f32.vlgmr.msra.gmra.mrb[6].mxu1 %vm300_vm2, %v716_v61 }
 0x854   :  { %1842 = vmatpush3.bf16.msra.mxu1 %v2073_v15  ;;  %1767 = vmatprep.mubr.msk.f32.mxu1 %vm2013_vm0, %v2014_v4 }
 0x855   :  { %1843 = vmatprep.subr.bf16.mxu1 %v2012_v2 }
 0x858   :  { %1845 = vmatpush3.bf16.msra.mxu1 %v2108_v32 }
 0x859   :  { %1852 = vmatprep.subr.bf16.mxu1 %v2012_v2 }
 0x926   :  { %v785_v62 = vpop.f32.mrb[6].mxu1 }
 0x927   :  { %v789_v63 = vadd.f32 %v785_v62, %v2149_v1  ;;  %v1747_v3 = vpop.f32.mrb[7].mxu1 }
 0x929   :  { %1914 = vtanh.f32 %v789_v63  ;;  %v1622_v7 = vmul.f32 -1.442695, %v789_v63 }
 0x92b   :  { %1916 = vpow2.f32 %v1622_v7 }
 0x933   :  { %v1915_v6 = vpop.eup %1914 }
 0x934   :  { %799 = vrot.lane.b32.xlu0 %v1915_v6, %s2016_s19 }
 0x935   :  { %v1917_v8 = vpop.eup %1916 }
 0x936   :  { %v793_v9 = vadd.f32 1.0, %v1917_v8 }
 0x938   :  { %1918 = vrcp.f32 %v793_v9 }
 0x942   :  { %v1919_v10 = vpop.eup %1918 }
 0x943   :  { %v797_v13 = vmul.f32 %v1919_v10, %v674_v54 }
 0x9a6   :  { %v800_v11 = vpop.permute.xlu0 %799 }
 0x9a7   :  { %v802_v12 = vmul.f32 %v1919_v10, %v800_v11 }
 0x9a9   :  { %804 = vrot.lane.b32.xlu1 %v802_v12, %s2017_s20 }
 0xa1b   :  { %v805_v14 = vpop.permute.xlu1 %804 }
 0xa1c   :  { %v807_v16 = vadd.f32 %v805_v14, %v797_v13 }
 0xa1e   :  { %1920 = vtanh.f32 %v807_v16 }
 0xa28   :  { %v1921_v1 = vpop.eup %1920 }
 0xa29   :  { %810 = vrot.lane.b32.xlu0 %v1921_v1, %s2016_s19 }
 0xa9b   :  { %v811_v17 = vpop.permute.xlu0 %810 }
 0xa9c   :  { %v2201_v19 = vmul.f32 %v1919_v10, %v811_v17 }
 0xa9e   :  { %v847_v20 = vrot.slane %v2201_v19, %v2105_v30 }
 0xaa0   :  { %848 = vrot.lane.b32.xlu1 %v847_v20, %s2017_s20 }
 0xb12   :  { %v849_v21 = vpop.permute.xlu1 %848 }
 0xb13   :  { %1757 = vmatmul.mubr.msk.f32.vlgmr.msra.gmra.mrb[4].mxu0 %vm300_vm2, %v849_v21  ;;  %v2018_v21 = vmov 16  }
 0xb14   :  { %1848 = vmatpush3.bf16.msra.mxu0 %v2073_v15  ;;  %1778 = vmatprep.mubr.msk.f32.mxu0 %vm2013_vm0, %v2014_v4 }
 0xb15   :  { %1849 = vmatprep.subr.bf16.mxu0 %v2012_v2  ;;  %1873 = vset.pattern.permute.xlu0 %v2018_v21 }
 0xb16   :  { %1879 = vset.pattern.permute.xlu1 %v2018_v21 }
 0xb18   :  { %1851 = vmatpush3.bf16.msra.mxu0 %v2108_v32 }
 0xb19   :  { %1858 = vmatprep.subr.bf16.mxu0 %v2012_v2 }
 0xbe6   :  { %v918_v22 = vpop.f32.mrb[4].mxu0 }
 0xbe7   :  { %v922_v23 = vadd.f32 %v918_v22, %v2138_v53  ;;  %v1758_v24 = vpop.f32.mrb[5].mxu0 }
 0xbe9   :  { %1922 = vtanh.f32 %v922_v23  ;;  %v1625_v26 = vmul.f32 -1.442695, %v922_v23 }
 0xbeb   :  { %1924 = vpow2.f32 %v1625_v26  ;;  %v1617_v26 = vsel %vm548_vm4, 1.0, %v2014_v4 }
 0xbf3   :  { %v1923_v25 = vpop.eup %1922 }
 0xbf4   :  { %932 = vrot.lane.b32.xlu0 %v1923_v25, %s2016_s19  ;;  %v1613_v25 = vsel %vm399_vm3, 1.0, %v2014_v4 }
 0xbf5   :  { %v1925_v27 = vpop.eup %1924 }
 0xbf6   :  { %v926_v28 = vadd.f32 1.0, %v1925_v27 }
 0xbf8   :  { %1926 = vrcp.f32 %v926_v28  ;;  %v1874_v28 = vpack.i.bf16 %v1617_v26, %v1613_v25 }
 0xc02   :  { %v1927_v29 = vpop.eup %1926 }
 0xc03   :  { %v930_v34 = vmul.f32 %v1927_v29, %v807_v16 }
 0xc66   :  { %v933_v31 = vpop.permute.xlu0 %932 }
 0xc67   :  { %v935_v33 = vmul.f32 %v1927_v29, %v933_v31  ;;  %v1635_v31 = vsel %vm1346_vm5, 1.0, %v2014_v4 }
 0xc69   :  { %937 = vrot.lane.b32.xlu1 %v935_v33, %s2017_s20 }
 0xcdb   :  { %v938_v35 = vpop.permute.xlu1 %937 }
 0xcdc   :  { %v940_v36 = vadd.f32 %v938_v35, %v930_v34 }
 0xcde   :  { %1928 = vtanh.f32 %v940_v36 }
 0xce8   :  { %v1929_v53 = vpop.eup %1928 }
 0xce9   :  { %943 = vrot.lane.b32.xlu0 %v1929_v53, %s2016_s19 }
 0xd5b   :  { %v944_v37 = vpop.permute.xlu0 %943 }
 0xd5c   :  { %v2217_v39 = vmul.f32 %v1927_v29, %v944_v37  ;;  %v1614_v29 = vld [vmem:[%s2382_s2 + $0x69] ss:$0 sm:$0xff]  ;;  %v1620_v37 = vsel %vm681_vm6, 1.0, %v2014_v4 }
 0xd5e   :  { %v980_v40 = vrot.slane %v2217_v39, %v2105_v30 }
 0xd60   :  { %981 = vrot.lane.b32.xlu1 %v980_v40, %s2017_s20  ;;  %v1623_v40 = vsel %vm814_vm7, 1.0, %v2014_v4 }
 0xdd2   :  { %v982_v41 = vpop.permute.xlu1 %981 }
 0xdd3   :  { %1768 = vmatmul.mubr.msk.f32.vlgmr.msra.gmra.mrb[8].mxu1 %vm300_vm2, %v982_v41 }
 0xdd4   :  { %1854 = vmatpush3.bf16.msra.mxu1 %v2073_v15  ;;  %1789 = vmatprep.mubr.msk.f32.mxu1 %vm2013_vm0, %v2014_v4 }
 0xdd5   :  { %1855 = vmatprep.subr.bf16.mxu1 %v2012_v2 }
 0xdd8   :  { %1857 = vmatpush3.bf16.msra.mxu1 %v2108_v32 }
 0xea6   :  { %v1051_v42 = vpop.f32.mrb[8].mxu1 }
 0xea7   :  { %v1055_v43 = vadd.f32 %v1051_v42, %v2141_v57  ;;  %v1769_v44 = vpop.f32.mrb[9].mxu1  ;;  %v1880_v42 = vpack.i.bf16 %v1623_v40, %v1620_v37 }
 0xea8   :  { %v1629_v44 = vsel %vm1080_vm9, 1.0, %v2014_v4 }
 0xea9   :  { %1930 = vtanh.f32 %v1055_v43  ;;  %v1628_v46 = vmul.f32 -1.442695, %v1055_v43  ;;  %v1626_v43 = vsel %vm947_vm8, 1.0, %v2014_v4 }
 0xeab   :  { %1932 = vpow2.f32 %v1628_v46  ;;  %v1632_v46 = vsel %vm1213_vm10, 1.0, %v2014_v4 }
 0xeb3   :  { %v1931_v45 = vpop.eup %1930 }
 0xeb4   :  { %1065 = vrot.lane.b32.xlu0 %v1931_v45, %s2016_s19  ;;  %v1885_v45 = vpack.i.bf16 %v1629_v44, %v1626_v43 }
 0xeb5   :  { %v1933_v47 = vpop.eup %1932 }
 0xeb6   :  { %v1059_v48 = vadd.f32 1.0, %v1933_v47 }
 0xeb8   :  { %1934 = vrcp.f32 %v1059_v48 }
 0xec2   :  { %v1935_v15 = vpop.eup %1934 }
 0xec3   :  { %v1063_v51 = vmul.f32 %v1935_v15, %v940_v36 }
 0xf26   :  { %v1066_v49 = vpop.permute.xlu0 %1065 }
 0xf27   :  { %v1068_v50 = vmul.f32 %v1935_v15, %v1066_v49 }
 0xf29   :  { %1070 = vrot.lane.b32.xlu1 %v1068_v50, %s2017_s20 }
 0xf9b   :  { %v1071_v32 = vpop.permute.xlu1 %1070 }
 0xf9c   :  { %v1073_v52 = vadd.f32 %v1071_v32, %v1063_v51 }
 0xf9e   :  { %1936 = vtanh.f32 %v1073_v52 }
 0xfa8   :  { %v1937_v57 = vpop.eup %1936 }
 0xfa9   :  { %1076 = vrot.lane.b32.xlu0 %v1937_v57, %s2016_s19 }
0x101b   :  { %v1077_v54 = vpop.permute.xlu0 %1076 }
0x101c   :  { %v2232_v55 = vmul.f32 %v1935_v15, %v1077_v54 }
0x101e   :  { %v1113_v56 = vrot.slane %v2232_v55, %v2105_v30 }
0x1020   :  { %1114 = vrot.lane.b32.xlu1 %v1113_v56, %s2017_s20 }
0x1092   :  { %v1115_v60 = vpop.permute.xlu1 %1114 }
0x1093   :  { %1779 = vmatmul.mubr.msk.f32.vlgmr.msra.gmra.mrb[6].mxu0 %vm300_vm2, %v1115_v60 }
0x1094   :  { %1800 = vmatprep.mubr.msk.f32.mxu0 %vm2013_vm0, %v2014_v4 }
0x1166   :  { %v1184_v61 = vpop.f32.mrb[6].mxu0 }
0x1167   :  { %v1188_v62 = vadd.f32 %v1184_v61, %v2143_v58  ;;  %v1780_v63 = vpop.f32.mrb[7].mxu0 }
0x1169   :  { %1938 = vtanh.f32 %v1188_v62  ;;  %v1631_v6 = vmul.f32 -1.442695, %v1188_v62 }
0x116b   :  { %1940 = vpow2.f32 %v1631_v6 }
0x1173   :  { %v1939_v3 = vpop.eup %1938 }
0x1174   :  { %1198 = vrot.lane.b32.xlu0 %v1939_v3, %s2016_s19 }
0x1175   :  { %v1941_v7 = vpop.eup %1940 }
0x1176   :  { %v1192_v8 = vadd.f32 1.0, %v1941_v7 }
0x1178   :  { %1942 = vrcp.f32 %v1192_v8 }
0x1182   :  { %v1943_v9 = vpop.eup %1942 }
0x1183   :  { %v1196_v12 = vmul.f32 %v1943_v9, %v1073_v52 }
0x11e6   :  { %v1199_v10 = vpop.permute.xlu0 %1198 }
0x11e7   :  { %v1201_v11 = vmul.f32 %v1943_v9, %v1199_v10 }
0x11e9   :  { %1203 = vrot.lane.b32.xlu1 %v1201_v11, %s2017_s20 }
0x125b   :  { %v1204_v13 = vpop.permute.xlu1 %1203 }
0x125c   :  { %v2243_v14 = vadd.f32 %v1204_v13, %v1196_v12 }
0x125e   :  { %1944 = vtanh.f32 %v2243_v14 }
0x1268   :  { %v1945_v58 = vpop.eup %1944 }
0x1269   :  { %1209 = vrot.lane.b32.xlu0 %v1945_v58, %s2016_s19 }
0x12db   :  { %v1210_v16 = vpop.permute.xlu0 %1209 }
0x12dc   :  { %v2247_v1 = vmul.f32 %v1943_v9, %v1210_v16 }
0x12de   :  { %v1246_v17 = vrot.slane %v2247_v1, %v2105_v30 }
0x12e0   :  { %1247 = vrot.lane.b32.xlu1 %v1246_v17, %s2017_s20 }
0x1352   :  { %v1248_v20 = vpop.permute.xlu1 %1247 }
0x1353   :  { %1790 = vmatmul.mubr.msk.f32.vlgmr.msra.gmra.mrb[10].mxu1 %vm300_vm2, %v1248_v20 }
0x1426   :  { %v1317_v22 = vpop.f32.mrb[10].mxu1 }
0x1427   :  { %v1321_v23 = vadd.f32 %v1317_v22, %v2147_v0  ;;  %v1791_v24 = vpop.f32.mrb[11].mxu1  ;;  %v419_v0 = vrot.slane %v1614_v29, %v2105_v30 }
0x1429   :  { %1946 = vtanh.f32 %v1321_v23  ;;  %v1634_v33 = vmul.f32 -1.442695, %v1321_v23 }
0x142b   :  { %1948 = vpow2.f32 %v1634_v33 }
0x1433   :  { %v1947_v27 = vpop.eup %1946 }
0x1434   :  { %1331 = vrot.lane.b32.xlu0 %v1947_v27, %s2016_s19 }
0x1435   :  { %v1949_v34 = vpop.eup %1948 }
0x1436   :  { %v1325_v35 = vadd.f32 1.0, %v1949_v34 }
0x1438   :  { %1875 = vperm.xlu0 %1873, %v1874_v28   ;;  %1950 = vrcp.f32 %v1325_v35 }
0x143c   :  { %420 = vrot.lane.b32.xlu0 %v419_v0, %s2019_s23 }
0x1440   :  { %1351 = vperm.xlu0 %1873, %v1635_v31  }
0x1442   :  { %v2267_v36 = vpop.eup %1950 }
0x1443   :  { %v1329_v32 = vmul.f32 %v2267_v36, %v2243_v14 }
0x14a6   :  { %v1332_v53 = vpop.permute.xlu0 %1331 }
0x14a7   :  { %v1334_v41 = vmul.f32 %v2267_v36, %v1332_v53 }
0x14a9   :  { %1336 = vrot.lane.b32.xlu1 %v1334_v41, %s2017_s20 }
0x14ad   :  { %1881 = vperm.xlu1 %1879, %v1880_v42  }
0x14b1   :  { %1886 = vperm.xlu1 %1879, %v1885_v45  }
0x14b5   :  { %1218 = vperm.xlu1 %1879, %v1632_v46  }
0x14b7   :  { %v1876_v47 = vpop.permute.xlu0 %1875 }
0x14b8   :  { %v1877_v48 = vunpack.i.l.bf16 %v1876_v47  ;;  %v1878_v4 = vunpack.i.h.bf16 %v1876_v47 }
0x14ba   :  { %v2280_v15 = vmul.f32 %v1877_v48, %v2154_v18  ;;  %v2288_v54 = vmul.f32 %v1878_v4, %v2169_v38 }
0x14bb   :  { %v421_v49 = vpop.permute.xlu0 %420 }
0x14bc   :  { %v423_v50 = vmul.f32 %v421_v49, %v2280_v15  ;;  %v557_v18 = vmul.f32 %v2288_v54, %v421_v49  ;;  %v1389_v37 = vrot.slane %v2280_v15, %v2105_v30 }
0x14be   :  { %v431_v51 = vrot.slane %v423_v50, %v2105_v30  ;;  %v565_v60 = vrot.slane %v557_v18, %v2105_v30 }
0x14bf   :  { %v1352_v25 = vpop.permute.xlu0 %1351 }
0x14c0   :  { %432 = vrot.lane.b32.xlu0 %v431_v51, %s2017_s20 }
0x151b   :  { %v1337_v52 = vpop.permute.xlu1 %1336 }
0x151c   :  { %v1339_v57 = vadd.f32 %v1337_v52, %v1329_v32  ;;  %v24_v52 = vld [vmem:[%s2382_s2 + $0x48] sm:$0xff] }
0x151e   :  { %1952 = vtanh.f32 %v1339_v57  ;;  %v25_v57 = vld [vmem:[%s2382_s2 + $0x50] sm:$0xff] }
0x151f   :  { %v1859_v4 = vpack.c.bf16 %v25_v57, %v24_v52 }
0x1521   :  { %1860 = vmatpush3.bf16.msra.mxu0 %v1859_v4 }
0x1522   :  { %1861 = vmatprep.subr.bf16.mxu0 %v2012_v2 }
0x1528   :  { %v1953_v56 = vpop.eup %1952 }
0x1529   :  { %1342 = vrot.lane.b32.xlu1 %v1953_v56, %s2016_s19 }
0x152c   :  { %v1882_v61 = vpop.permute.xlu1 %1881 }
0x152d   :  { %v1884_v62 = vunpack.i.h.bf16 %v1882_v61  ;;  %v1883_v63 = vunpack.i.l.bf16 %v1882_v61  ;;  %566 = vrot.lane.b32.xlu1 %v565_v60, %s2017_s20 }
0x152f   :  { %v822_v3 = vmul.f32 %v1884_v62, %v2201_v19  ;;  %v2296_v6 = vmul.f32 %v1883_v63, %v2185_v59 }
0x1530   :  { %v1887_v7 = vpop.permute.xlu1 %1886 }
0x1531   :  { %v823_v38 = vmul.f32 %v822_v3, %v421_v49  ;;  %v690_v8 = vmul.f32 %v2296_v6, %v421_v49  ;;  %v1889_v9 = vunpack.i.h.bf16 %v1887_v7  ;;  %v1888_v10 = vunpack.i.l.bf16 %v1887_v7 }
0x1532   :  { %v433_v31 = vpop.permute.xlu0 %432  ;;  %v1439_v42 = vrot.slane %v822_v3, %v2105_v30  ;;  %v1422_v50 = vrot.slane %v2296_v6, %v2105_v30 }
0x1533   :  { %v1088_v11 = vmul.f32 %v1889_v9, %v2232_v55  ;;  %v2301_v12 = vmul.f32 %v1888_v10, %v2217_v39  ;;  %v698_v13 = vrot.slane %v690_v8, %v2105_v30  ;;  %v831_v14 = vrot.slane %v823_v38, %v2105_v30 }
0x1534   :  { %v1219_v58 = vpop.permute.xlu1 %1218  ;;  %v436_v41 = vsel %vm435_vm12, %v433_v31, 0.0 }
0x1535   :  { %v1089_v19 = vmul.f32 %v1088_v11, %v421_v49  ;;  %v956_v59 = vmul.f32 %v2301_v12, %v421_v49  ;;  %v1221_v16 = vmul.f32 %v1219_v58, %v2247_v1  ;;  %699 = vrot.lane.b32.xlu0 %v698_v13, %s2017_s20  ;;  %832 = vrot.lane.b32.xlu1 %v831_v14, %s2017_s20  ;;  %v1607_v1 = vld [vmem:[%s2382_s2 + $0x6a] ss:$0 sm:$0xff] }
0x1536   :  { %v36_v21 = vmul.f32 %v1607_v1, %v2053_v5  ;;  %v1473_v45 = vrot.slane %v1088_v11, %v2105_v30  ;;  %v1456_v51 = vrot.slane %v2301_v12, %v2105_v30 }
0x1537   :  { %v1222_v17 = vmul.f32 %v1221_v16, %v421_v49  ;;  %v964_v55 = vrot.slane %v956_v59, %v2105_v30  ;;  %v1097_v39 = vrot.slane %v1089_v19, %v2105_v30  ;;  %v1490_v32 = vrot.slane %v1221_v16, %v2105_v30 }
0x1538   :  { %v38_v22 = vsel %vm37_vm11, %v36_v21, 0.0 }
0x1539   :  { %965 = vrot.lane.b32.xlu0 %v964_v55, %s2017_s20  ;;  %1098 = vrot.lane.b32.xlu1 %v1097_v39, %s2017_s20  ;;  %v1230_v20 = vrot.slane %v1222_v17, %v2105_v30 }
0x153d   :  { %1231 = vrot.lane.b32.xlu0 %v1230_v20, %s2017_s20 }
0x155c   :  { %39 = vadd.xlane.f32.xlu0 %v38_v22 }
0x159b   :  { %v1343_v23 = vpop.permute.xlu1 %1342 }
0x159c   :  { %v1345_v24 = vmul.f32 %v2267_v36, %v1343_v23 }
0x159e   :  { %v1354_v26 = vmul.f32 %v1352_v25, %v1345_v24 }
0x159f   :  { %v567_v27 = vpop.permute.xlu1 %566 }
0x15a0   :  { %v1355_v28 = vmul.f32 %v1354_v26, %v421_v49  ;;  %v569_v29 = vsel %vm435_vm12, %v567_v27, 0.0  ;;  %v1507_v47 = vrot.slane %v1354_v26, %v2105_v30  ;;  %v1405_v49 = vrot.slane %v2288_v54, %v2105_v30  ;;  %v26_v54 = vld [vmem:[%s2382_s2 + $0x58] sm:$0xff] }
0x15a1   :  { %570 = vadd.xlane.f32.xlu0 %v569_v29 }
0x15a2   :  { %v1363_v0 = vrot.slane %v1355_v28, %v2105_v30  ;;  %v27_v30 = vld [vmem:[%s2382_s2 + $0x60] sm:$0xff] }
0x15a3   :  { %v1862_v18 = vpack.c.bf16 %v27_v30, %v26_v54 }
0x15a4   :  { %1364 = vrot.lane.b32.xlu1 %v1363_v0, %s2017_s20 }
0x15a5   :  { %1863 = vmatpush3.bf16.msra.mxu0 %v1862_v18 }
0x15a7   :  { %v700_v5 = vpop.permute.xlu0 %699  ;;  %v833_v40 = vpop.permute.xlu1 %832 }
0x15a8   :  { %v702_v33 = vsel %vm435_vm12, %v700_v5, 0.0  ;;  %v835_v43 = vsel %vm435_vm12, %v833_v40, 0.0 }
0x15a9   :  { %703 = vadd.xlane.f32.xlu0 %v702_v33 }
0x15ab   :  { %v966_v34 = vpop.permute.xlu0 %965  ;;  %v1099_v44 = vpop.permute.xlu1 %1098 }
0x15ac   :  { %v968_v35 = vsel %vm435_vm12, %v966_v34, 0.0  ;;  %v1101_v46 = vsel %vm435_vm12, %v1099_v44, 0.0 }
0x15ad   :  { %969 = vadd.xlane.f32.xlu0 %v968_v35 }
0x15af   :  { %v1232_v36 = vpop.permute.xlu0 %1231 }
0x15b0   :  { %v1234_v53 = vsel %vm435_vm12, %v1232_v36, 0.0 }
0x15b1   :  { %1235 = vadd.xlane.f32.xlu0 %v1234_v53 }
0x15c7   :  { %1390 = vrot.lane.b32.xlu0 %v1389_v37, %s2017_s20 }
0x15c8   :  { %437 = vadd.xlane.f32.xlu1 %v436_v41 }
0x15cb   :  { %1440 = vrot.lane.b32.xlu0 %v1439_v42, %s2017_s20 }
0x15cc   :  { %836 = vadd.xlane.f32.xlu1 %v835_v43 }
0x15cf   :  { %1474 = vrot.lane.b32.xlu0 %v1473_v45, %s2017_s20 }
0x15d0   :  { %1102 = vadd.xlane.f32.xlu1 %v1101_v46 }
0x15d3   :  { %1508 = vrot.lane.b32.xlu0 %v1507_v47, %s2017_s20 }
0x15e9   :  { %v40_v56 = vpop.xlane.xlu0 %39 }
0x1616   :  { %v1365_v48 = vpop.permute.xlu1 %1364 }
0x1617   :  { %v1367_v15 = vsel %vm435_vm12, %v1365_v48, 0.0 }
0x1618   :  { %1368 = vadd.xlane.f32.xlu1 %v1367_v15 }
0x1629   :  { %1406 = vrot.lane.b32.xlu1 %v1405_v49, %s2017_s20 }
0x162d   :  { %1423 = vrot.lane.b32.xlu1 %v1422_v50, %s2017_s20 }
0x162e   :  { %v571_v61 = vpop.xlane.xlu0 %570 }
0x162f   :  { %v572_v63 = vadd.f32 %v571_v61, %v40_v56 }
0x1631   :  { %1457 = vrot.lane.b32.xlu1 %v1456_v51, %s2017_s20 }
0x1635   :  { %1491 = vrot.lane.b32.xlu1 %v1490_v32, %s2017_s20 }
0x1636   :  { %v704_v3 = vpop.xlane.xlu0 %703 }
0x1637   :  { %v705_v7 = vadd.f32 %v704_v3, %v40_v56 }
0x163a   :  { %v970_v8 = vpop.xlane.xlu0 %969 }
0x163b   :  { %v971_v11 = vadd.f32 %v970_v8, %v40_v56 }
0x163e   :  { %v1236_v14 = vpop.xlane.xlu0 %1235 }
0x163f   :  { %v1237_v16 = vadd.f32 %v1236_v14, %v40_v56 }
0x1642   :  { %v1391_v46 = vpop.permute.xlu0 %1390 }
0x1646   :  { %v1441_v54 = vpop.permute.xlu0 %1440 }
0x1655   :  { %v438_v60 = vpop.xlane.xlu1 %437 }
0x1656   :  { %v439_v62 = vadd.f32 %v438_v60, %v40_v56 }
0x1658   :  { %1954 = vtanh.f32 %v439_v62 }
0x1659   :  { %v837_v6 = vpop.xlane.xlu1 %836  ;;  %1956 = vtanh.f32 %v572_v63 }
0x165a   :  { %v838_v38 = vadd.f32 %v837_v6, %v40_v56  ;;  %1958 = vtanh.f32 %v705_v7 }
0x165c   :  { %1960 = vtanh.f32 %v838_v38 }
0x165d   :  { %v1103_v9 = vpop.xlane.xlu1 %1102  ;;  %1962 = vtanh.f32 %v971_v11  ;;  %v1475_v11 = vpop.permute.xlu0 %1474 }
0x165e   :  { %v1104_v12 = vadd.f32 %v1103_v9, %v40_v56 }
0x1660   :  { %1964 = vtanh.f32 %v1104_v12 }
0x1661   :  { %1966 = vtanh.f32 %v1237_v16 }
0x1662   :  { %v1955_v10 = vpop.eup %1954 }
0x1663   :  { %v1957_v2 = vpop.eup %1956 }
0x1664   :  { %v1372_v13 = vmax.f32 %v1955_v10, %v1957_v2  ;;  %v1959_v58 = vpop.eup %1958 }
0x1666   :  { %v1373_v19 = vmax.f32 %v1372_v13, %v1959_v58  ;;  %v1961_v59 = vpop.eup %1960 }
0x1667   :  { %v1963_v20 = vpop.eup %1962 }
0x1668   :  { %v1374_v17 = vmax.f32 %v1373_v19, %v1961_v59 }
0x166a   :  { %v1375_v1 = vmax.f32 %v1374_v17, %v1963_v20  ;;  %v1965_v21 = vpop.eup %1964 }
0x166b   :  { %v1967_v23 = vpop.eup %1966 }
0x166c   :  { %v1376_v22 = vmax.f32 %v1375_v1, %v1965_v21 }
0x166e   :  { %v1377_v24 = vmax.f32 %v1376_v22, %v1967_v23 }
0x16a5   :  { %v1369_v55 = vpop.xlane.xlu1 %1368 }
0x16a6   :  { %v1370_v39 = vadd.f32 %v1369_v55, %v40_v56 }
0x16a8   :  { %1968 = vtanh.f32 %v1370_v39 }
0x16a9   :  { %v1407_v42 = vpop.permute.xlu1 %1406 }
0x16ad   :  { %v1424_v51 = vpop.permute.xlu1 %1423 }
0x16b1   :  { %v1458_v3 = vpop.permute.xlu1 %1457 }
0x16b2   :  { %v1969_v25 = vpop.eup %1968 }
0x16b3   :  { %v1378_v26 = vmax.f32 %v1377_v24, %v1969_v25 }
0x16b5   :  { %v1379_v27 = vsub.f32 %v1955_v10, %v1378_v26  ;;  %v1394_v28 = vsub.f32 %v1957_v2, %v1378_v26  ;;  %v1411_v29 = vsub.f32 %v1959_v58, %v1378_v26  ;;  %v1428_v0 = vsub.f32 %v1961_v59, %v1378_v26  ;;  %v1492_v14 = vpop.permute.xlu1 %1491  ;;  %v1509_v59 = vpop.permute.xlu0 %1508 }
0x16b6   :  { %v1445_v34 = vsub.f32 %v1963_v20, %v1378_v26  ;;  %v1462_v36 = vsub.f32 %v1965_v21, %v1378_v26  ;;  %v1479_v37 = vsub.f32 %v1967_v23, %v1378_v26  ;;  %v1496_v40 = vsub.f32 %v1969_v25, %v1378_v26  ;;  %v1636_v20 = vld [vmem:[%s2382_s2 + $0x68] ss:$0 sm:$0xff] }
0x16b7   :  { %v1380_v31 = vmul.f32 1.442695, %v1379_v27  ;;  %v1395_v5 = vmul.f32 1.442695, %v1394_v28  ;;  %v1412_v33 = vmul.f32 1.442695, %v1411_v29 }
0x16b8   :  { %v1429_v35 = vmul.f32 1.442695, %v1428_v0  ;;  %v1446_v53 = vmul.f32 1.442695, %v1445_v34  ;;  %v1463_v41 = vmul.f32 1.442695, %v1462_v36 }
0x16b9   :  { %1970 = vpow2.f32 %v1380_v31  ;;  %v1480_v43 = vmul.f32 1.442695, %v1479_v37  ;;  %v1497_v44 = vmul.f32 1.442695, %v1496_v40 }
0x16ba   :  { %1972 = vpow2.f32 %v1395_v5 }
0x16bb   :  { %1974 = vpow2.f32 %v1412_v33 }
0x16bc   :  { %1976 = vpow2.f32 %v1429_v35 }
0x16bd   :  { %1978 = vpow2.f32 %v1446_v53 }
0x16be   :  { %1980 = vpow2.f32 %v1463_v41 }
0x16bf   :  { %1982 = vpow2.f32 %v1480_v43 }
0x16c0   :  { %1984 = vpow2.f32 %v1497_v44 }
0x16c3   :  { %v1971_v45 = vpop.eup %1970 }
0x16c4   :  { %v1973_v47 = vpop.eup %1972  ;;  %v1393_v48 = vmul.f32 %v1971_v45, %v1391_v46 }
0x16c5   :  { %v1975_v15 = vpop.eup %1974  ;;  %v1397_v49 = vadd.f32 %v1973_v47, %v1971_v45  ;;  %v1409_v50 = vmul.f32 %v1973_v47, %v1407_v42 }
0x16c6   :  { %v1977_v32 = vpop.eup %1976  ;;  %v1426_v4 = vmul.f32 %v1975_v15, %v1424_v51 }
0x16c7   :  { %v1410_v52 = vadd.f32 %v1409_v50, %v1393_v48  ;;  %v1414_v57 = vadd.f32 %v1975_v15, %v1397_v49  ;;  %v1979_v56 = vpop.eup %1978  ;;  %v1443_v60 = vmul.f32 %v1977_v32, %v1441_v54 }
0x16c8   :  { %v1981_v62 = vpop.eup %1980  ;;  %v1460_v38 = vmul.f32 %v1979_v56, %v1458_v3 }
0x16c9   :  { %v1427_v30 = vadd.f32 %v1426_v4, %v1410_v52  ;;  %v1431_v18 = vadd.f32 %v1977_v32, %v1414_v57  ;;  %v1983_v7 = vpop.eup %1982  ;;  %v1477_v12 = vmul.f32 %v1981_v62, %v1475_v11 }
0x16ca   :  { %v1985_v9 = vpop.eup %1984  ;;  %v1494_v58 = vmul.f32 %v1983_v7, %v1492_v14 }
0x16cb   :  { %v1448_v61 = vadd.f32 %v1979_v56, %v1431_v18  ;;  %v1444_v63 = vadd.f32 %v1443_v60, %v1427_v30  ;;  %v1511_v16 = vmul.f32 %v1985_v9, %v1509_v59 }
0x16cd   :  { %v1465_v6 = vadd.f32 %v1981_v62, %v1448_v61  ;;  %v1461_v10 = vadd.f32 %v1460_v38, %v1444_v63 }
0x16cf   :  { %v1482_v8 = vadd.f32 %v1983_v7, %v1465_v6  ;;  %v1478_v13 = vadd.f32 %v1477_v12, %v1461_v10 }
0x16d1   :  { %v1499_v2 = vadd.f32 %v1985_v9, %v1482_v8  ;;  %v1495_v19 = vadd.f32 %v1494_v58, %v1478_v13 }
0x16d3   :  { %1986 = vrcp.f32 %v1499_v2  ;;  %v1512_v17 = vadd.f32 %v1511_v16, %v1495_v19 }
0x16dd   :  { %v1987_v55 = vpop.eup %1986 }
0x16de   :  { %v1514_v39 = vmul.f32 %v1987_v55, %v1512_v17 }
0x16e0   :  { %1801 = vmatmul.mubr.msk.f32.vlgmr.msra.gmra.mrb[8].mxu0 %vm300_vm2, %v1514_v39 }
0x17b3   :  { %v1588_v1 = vpop.f32.mrb[8].mxu0 }
0x17b4   :  { %v1589_v21 = vadd.f32 %v1636_v20, %v1588_v1  ;;  %v1802_v22 = vpop.f32.mrb[9].mxu0 }
0x17b6   :  { %1592 = vst.msk [vmem:[#allocation2] sm:$0x3] %vm435_vm12, %v1589_v21 }
0x17b7   :  { %1999 = shalt.err (!%p1996_p4)
}
0x17b8   :  { %s2000_s13 = scalar_lea.hbm %s2383_s3, 32 }
0x17b9   :  { %p2001_p5 = scmp.ne.s32.totalorder %s2383_s3, %s2000_s13  ;;  %p2004_p6 = scmp.lt.u32.totalorder %s2000_s13, %s2383_s3 }
0x17bb   :  { %p2006_p7 = pnand %p2004_p6, %p2001_p5 }
0x17bd   :  { %2009 = shalt.err (!%p2006_p7)
}
0x17be   :  { %1602 = dma.vmem_to_hbm [thread:$0]  %s1600_s9, 32, %s2383_s3, [#allocation3]  }
0x17bf   :  { %2010 = dma.done.wait [#allocation3], 32  }
0x17c0   :  { %2011 = vsyncadd [#allocation3], 4294967264 }
0x17c1   :  { %1606 = vsyncpa [#allocation3], 1 }

</bundles_post_ra>
